<compile_context>
chip_gen: v7x
topology: tpu7x:2x2x1
jax: 0.10.0
libtpu: 0.0.40
codegen_flags: <defaults>
</compile_context>

<pallas_src>
import functools

import jax
import jax.numpy as jnp
from jax import lax
from jax.experimental import pallas as pl
from jax.experimental.pallas import tpu as pltpu

BF16 = jnp.bfloat16
F32 = jnp.float32
VMEM_LIMIT = 48 * 1024 * 1024   # safe on v5e/v6e (128 MiB) and v7x (64 MiB per core)
NEG_INF = -1e30
LM_VOCAB_TILE = 512             # lane-dense vocab tile; vocab padded to a multiple of it


def _round_up(n, m):
    return ((n + m - 1) // m) * m


def _seq_plan(S):
    """(padded seq length, seq tile): tile is sublane-aligned and divides S_pad."""
    if S >= 256:
        tile = 256          # fills the 256x256 MXU on v6e/v7x; fine on v5e
    elif S >= 128:
        tile = 128
    else:
        tile = _round_up(S, 8)
    return _round_up(S, tile), tile


def _row_tile(R):
    for t in (512, 256, 128, 64, 32, 16, 8):
        if R % t == 0:
            return t
    return R


def _const_spec(arr):
    # Constant block index -> fetched once, VMEM-resident across the grid.
    # TODO(synk): on v7x (64 MiB VMEM) consider pipeline_mode=pl.Buffered(1) here to
    # single-buffer weight blocks, and add FFN hidden-dim reduction tiling for large D.
    nd = arr.ndim
    return pl.BlockSpec(arr.shape, lambda *_: (0,) * nd)


def _layernorm(x, gamma, beta, eps=1e-5):
    mean = jnp.mean(x, axis=-1, keepdims=True)
    var = jnp.mean((x - mean) ** 2, axis=-1, keepdims=True)
    return (x - mean) * lax.rsqrt(var + eps) * gamma + beta


# ---------------- Pallas kernels ----------------

def qkv_kernel(x_ref, g_ref, b_ref, w_ref, bias_ref, q_ref, k_ref, v_ref, *, D):
    """LN1 + fused QKV projection; emits q/k/v as separate lane-dense tiles."""
    x = x_ref[0]                                              # (TS, D) f32
    h = _layernorm(x, g_ref[0], b_ref[0])
    qkv = jnp.dot(h.astype(BF16), w_ref[...],
                  preferred_element_type=jnp.float32) + bias_ref[0]
    qkv = qkv.astype(BF16)                                    # (TS, 3D)
    q_ref[0] = qkv[:, :D]
    k_ref[0] = qkv[:, D:2 * D]
    v_ref[0] = qkv[:, 2 * D:]


def flash_attn_kernel(q_ref, k_ref, v_ref, o_ref, m_sc, l_sc, acc_sc,
                      *, scale, num_heads, head_dim, tile_q, tile_k):
    """Causal flash attention. grid = (B, q-tiles, kv-tiles); q/k/v blocks are
    lane-dense (1, tile, D); heads are split with static lane slices in-kernel."""
    qi = pl.program_id(1)
    ki = pl.program_id(2)

    @pl.when(ki == 0)
    def _():
        m_sc[...] = jnp.full_like(m_sc, NEG_INF)
        l_sc[...] = jnp.zeros_like(l_sc)
        acc_sc[...] = jnp.zeros_like(acc_sc)

    def process(apply_mask):
        q = q_ref[0]                                          # (TQ, D) bf16
        k = k_ref[0]                                          # (TK, D) bf16
        v = v_ref[0]
        if apply_mask:
            q_pos = qi * tile_q + lax.broadcasted_iota(jnp.int32, (tile_q, tile_k), 0)
            k_pos = ki * tile_k + lax.broadcasted_iota(jnp.int32, (tile_q, tile_k), 1)
            causal = k_pos <= q_pos
        for h in range(num_heads):                            # unrolled, 2-D MXU ops only
            sl = slice(h * head_dim, (h + 1) * head_dim)
            s = lax.dot_general(q[:, sl], k[:, sl],
                                (((1,), (1,)), ((), ())),
                                preferred_element_type=jnp.float32) * scale
            if apply_mask:
                s = jnp.where(causal, s, NEG_INF)
            m_prev = m_sc[h]                                  # (TQ, 1)
            m_new = jnp.maximum(m_prev, jnp.max(s, axis=-1, keepdims=True))
            alpha = jnp.exp(m_prev - m_new)
            p = jnp.exp(s - m_new)
            l_sc[h] = alpha * l_sc[h] + jnp.sum(p, axis=-1, keepdims=True)
            acc_sc[h] = alpha * acc_sc[h] + jnp.dot(
                p.astype(BF16), v[:, sl], preferred_element_type=jnp.float32)
            m_sc[h] = m_new

    # Fully-below-diagonal tiles: no iota / compare / select.
    @pl.when(ki < qi)
    def _():
        process(apply_mask=False)

    # Diagonal tile (tile_q == tile_k): the only partially masked one.
    @pl.when(ki == qi)
    def _():
        process(apply_mask=True)

    # ki > qi: fully masked -> compute skipped; K/V DMA also avoided via index clamp.

    @pl.when(ki == pl.num_programs(2) - 1)
    def _():
        for h in range(num_heads):
            ctx = acc_sc[h] / l_sc[h]                         # exact normalization
            o_ref[0, :, h * head_dim:(h + 1) * head_dim] = ctx.astype(o_ref.dtype)


def proj_ffn_kernel(x_ref, ctx_ref, wo_ref, bo_ref, g2_ref, bt2_ref,
                    w1_ref, b1_ref, w2_ref, b2_ref, o_ref):
    """Attention output projection + residual, then LN2 + MLP + residual."""
    x = x_ref[0]                                              # (TS, D) f32
    attn = jnp.dot(ctx_ref[0], wo_ref[...],
                   preferred_element_type=jnp.float32) + bo_ref[0]
    y = x + attn

    h = _layernorm(y, g2_ref[0], bt2_ref[0])
    ff = jnp.dot(h.astype(BF16), w1_ref[...],
                 preferred_element_type=jnp.float32) + b1_ref[0]
    # TODO(synk): reference TransformerBlock source not provided; GPT-2-style tanh GELU assumed.
    ff = jax.nn.gelu(ff, approximate=True)
    ff = jnp.dot(ff.astype(BF16), w2_ref[...],
                 preferred_element_type=jnp.float32) + b2_ref[0]
    o_ref[0] = y + ff


def final_ln_kernel(x_ref, g_ref, b_ref, o_ref):
    """Final LayerNorm + bf16 cast, once per seq tile (hoisted out of lm_head)."""
    o_ref[0] = _layernorm(x_ref[0], g_ref[0], b_ref[0]).astype(o_ref.dtype)


def lm_head_kernel(h_ref, w_ref, b_ref, o_ref):
    """Pure vocab-tiled matmul over flattened rows (LN already applied)."""
    o_ref[...] = jnp.dot(h_ref[...], w_ref[...],
                         preferred_element_type=jnp.float32) + b_ref[0]


# ---------------- pallas_call wrappers ----------------

def run_qkv(x, blk, tile_s):
    B, S, D = x.shape
    weights = [blk["ln1_g"], blk["ln1_b"], blk["w_qkv"], blk["b_qkv"]]
    spec = pl.BlockSpec((1, tile_s, D), lambda b, s: (b, s, 0))
    out = jax.ShapeDtypeStruct((B, S, D), BF16)
    return pl.pallas_call(
        functools.partial(qkv_kernel, D=D),
        out_shape=(out, out, out),
        grid=(B, S // tile_s),
        in_specs=[spec] + [_const_spec(w) for w in weights],
        out_specs=(spec, spec, spec),
        compiler_params=pltpu.CompilerParams(
            dimension_semantics=("parallel", "parallel"),
            vmem_limit_bytes=VMEM_LIMIT),
    )(x, *weights)


def run_flash_attn(q, k, v, num_heads, tile):
    B, S, D = q.shape
    hd = D // num_heads
    scale = 1.0 / (hd ** 0.5)
    nq = S // tile
    kernel = functools.partial(flash_attn_kernel, scale=scale,
                               num_heads=num_heads, head_dim=hd,
                               tile_q=tile, tile_k=tile)
    q_spec = pl.BlockSpec((1, tile, D), lambda b, qi, ki: (b, qi, 0))
    # Clamp the kv block index to the causal range: above-diagonal steps reuse the
    # already-fetched diagonal block instead of DMAing data that is discarded.
    kv_spec = pl.BlockSpec((1, tile, D),
                           lambda b, qi, ki: (b, jnp.minimum(ki, qi), 0))
    return pl.pallas_call(
        kernel,
        out_shape=jax.ShapeDtypeStruct((B, S, D), BF16),
        grid=(B, nq, nq),
        in_specs=[q_spec, kv_spec, kv_spec],
        out_specs=pl.BlockSpec((1, tile, D), lambda b, qi, ki: (b, qi, 0)),
        scratch_shapes=[pltpu.VMEM((num_heads, tile, 1), F32),
                        pltpu.VMEM((num_heads, tile, 1), F32),
                        pltpu.VMEM((num_heads, tile, hd), F32)],
        compiler_params=pltpu.CompilerParams(
            dimension_semantics=("parallel", "parallel", "arbitrary"),
            vmem_limit_bytes=VMEM_LIMIT),
    )(q, k, v)


def run_proj_ffn(x, ctx, blk, tile_s):
    B, S, D = x.shape
    weights = [blk["wo"], blk["bo"], blk["ln2_g"], blk["ln2_b"],
               blk["w1"], blk["b1"], blk["w2"], blk["b2"]]
    return pl.pallas_call(
        proj_ffn_kernel,
        out_shape=jax.ShapeDtypeStruct((B, S, D), F32),
        grid=(B, S // tile_s),
        in_specs=[pl.BlockSpec((1, tile_s, D), lambda b, s: (b, s, 0)),
                  pl.BlockSpec((1, tile_s, D), lambda b, s: (b, s, 0))]
                 + [_const_spec(w) for w in weights],
        out_specs=pl.BlockSpec((1, tile_s, D), lambda b, s: (b, s, 0)),
        compiler_params=pltpu.CompilerParams(
            dimension_semantics=("parallel", "parallel"),
            vmem_limit_bytes=VMEM_LIMIT),
    )(x, ctx, *weights)


def run_final_ln(x, gamma, beta, tile_s):
    B, S, D = x.shape
    return pl.pallas_call(
        final_ln_kernel,
        out_shape=jax.ShapeDtypeStruct((B, S, D), BF16),
        grid=(B, S // tile_s),
        in_specs=[pl.BlockSpec((1, tile_s, D), lambda b, s: (b, s, 0)),
                  _const_spec(gamma), _const_spec(beta)],
        out_specs=pl.BlockSpec((1, tile_s, D), lambda b, s: (b, s, 0)),
        compiler_params=pltpu.CompilerParams(
            dimension_semantics=("parallel", "parallel"),
            vmem_limit_bytes=VMEM_LIMIT),
    )(x, gamma, beta)


def run_lm_head(h2d, w, bias, tile_r, tile_v):
    R, D = h2d.shape
    V = w.shape[1]
    # Vocab axis outermost -> each (D, tile_v) weight block is streamed from HBM once,
    # independent of how many row tiles there are.
    return pl.pallas_call(
        lm_head_kernel,
        out_shape=jax.ShapeDtypeStruct((R, V), F32),
        grid=(V // tile_v, R // tile_r),
        in_specs=[pl.BlockSpec((tile_r, D), lambda v, r: (r, 0)),
                  pl.BlockSpec((D, tile_v), lambda v, r: (0, v)),
                  pl.BlockSpec((1, tile_v), lambda v, r: (0, v))],
        out_specs=pl.BlockSpec((tile_r, tile_v), lambda v, r: (r, v)),
        compiler_params=pltpu.CompilerParams(
            dimension_semantics=("parallel", "parallel"),
            vmem_limit_bytes=VMEM_LIMIT),
    )(h2d, w, bias)


# ---------------- model: params + forward ----------------

def init_params(key, vocab_size, D, num_layers, context_length):
    def lin(k, fan_in, fan_out):
        return (0.02 * jax.random.normal(k, (fan_in, fan_out), F32)).astype(BF16)

    V_pad = _round_up(vocab_size, LM_VOCAB_TILE)
    keys = jax.random.split(key, 4 + num_layers)
    lm_w = jnp.zeros((D, V_pad), BF16).at[:, :vocab_size].set(lin(keys[2], D, vocab_size))
    params = {
        "tok_emb": 0.02 * jax.random.normal(keys[0], (vocab_size, D), F32),
        "pos_emb": 0.02 * jax.random.normal(keys[1], (context_length, D), F32),
        "ln_f_g": jnp.ones((1, D), F32),
        "ln_f_b": jnp.zeros((1, D), F32),
        "lm_w": lm_w,                          # vocab padded to a multiple of LM_VOCAB_TILE
        "lm_b": jnp.zeros((1, V_pad), F32),
        "blocks": [],
    }
    for li in range(num_layers):
        bk = jax.random.split(keys[4 + li], 4)
        params["blocks"].append({
            "ln1_g": jnp.ones((1, D), F32), "ln1_b": jnp.zeros((1, D), F32),
            "w_qkv": lin(bk[0], D, 3 * D), "b_qkv": jnp.zeros((1, 3 * D), F32),
            "wo": lin(bk[1], D, D), "bo": jnp.zeros((1, D), F32),
            "ln2_g": jnp.ones((1, D), F32), "ln2_b": jnp.zeros((1, D), F32),
            "w1": lin(bk[2], D, 4 * D), "b1": jnp.zeros((1, 4 * D), F32),
            "w2": lin(bk[3], 4 * D, D), "b2": jnp.zeros((1, D), F32),
        })
    return params


def gpt_forward(idx, params, num_heads, vocab_size):
    B, S = idx.shape
    D = params["tok_emb"].shape[1]
    S_pad, tile_s = _seq_plan(S)

    # TODO(synk): embedding gathers are data-dependent indexing; kept in JAX glue.
    tok = jnp.take(params["tok_emb"], idx, axis=0)            # (B, S, D)
    pos = params["pos_emb"][:S]
    x = tok + pos[None, :, :]
    if S_pad != S:
        x = jnp.pad(x, ((0, 0), (0, S_pad - S), (0, 0)))      # padded rows sliced off later

    for blk in params["blocks"]:
        q, k, v = run_qkv(x, blk, tile_s)                     # each (B, S_pad, D) bf16
        ctx = run_flash_attn(q, k, v, num_heads, tile_s)      # (B, S_pad, D) bf16, heads merged
        x = run_proj_ffn(x, ctx, blk, tile_s)                 # (B, S_pad, D) f32

    h = run_final_ln(x, params["ln_f_g"], params["ln_f_b"], tile_s)   # (B, S_pad, D) bf16
    R = B * S_pad
    logits = run_lm_head(h.reshape(R, D), params["lm_w"], params["lm_b"],
                         _row_tile(R), LM_VOCAB_TILE)         # (R, V_pad) f32
    logits = logits.reshape(B, S_pad, -1)[:, :S, :vocab_size]
    return logits


if __name__ == "__main__":
    vocab_size, embed_dim, num_heads, num_layers = 64, 32, 4, 2
    batch, seq, context_len = 2, 8, 8

    key = jax.random.PRNGKey(0)
    kp, kd = jax.random.split(key)
    params = init_params(kp, vocab_size, embed_dim, num_layers, context_len)
    idx = jax.random.randint(kd, (batch, seq), 0, vocab_size, dtype=jnp.int32)

    fwd = jax.jit(functools.partial(gpt_forward, num_heads=num_heads,
                                    vocab_size=vocab_size))
    logits = jax.block_until_ready(fwd(idx, params))
    assert logits.shape == (batch, seq, vocab_size), logits.shape
    assert bool(jnp.all(jnp.isfinite(logits)))
    print("KERNEL_OK")
</pallas_src>

<mosaic_0001>
module attributes {stable_mosaic.version = 11 : i64} {
  func.func @qkv_kernel(%arg0: i32, %arg1: i32, %arg2: memref<1x8x32xf32, #tpu.memory_space<vmem>>, %arg3: memref<1x32xf32, #tpu.memory_space<vmem>>, %arg4: memref<1x32xf32, #tpu.memory_space<vmem>>, %arg5: memref<32x96xbf16, #tpu.memory_space<vmem>>, %arg6: memref<1x96xf32, #tpu.memory_space<vmem>>, %arg7: memref<1x8x32xbf16, #tpu.memory_space<vmem>>, %arg8: memref<1x8x32xbf16, #tpu.memory_space<vmem>>, %arg9: memref<1x8x32xbf16, #tpu.memory_space<vmem>>) attributes {dimension_semantics = [#tpu.dimension_semantics<parallel>, #tpu.dimension_semantics<parallel>], iteration_bounds = array<i64: 2, 1>, scalar_prefetch = 0 : i64, scratch_operands = 0 : i64, tpu.core_type = #tpu.core_type<tc>, window_params = [{transform_indices = @transform_0, window_bounds = array<i64: 1, 8, 32>}, {pipeline_mode = #tpu.pipeline_mode<synchronous>, transform_indices = @transform_1, window_bounds = array<i64: 1, 32>}, {pipeline_mode = #tpu.pipeline_mode<synchronous>, transform_indices = @transform_2, window_bounds = array<i64: 1, 32>}, {pipeline_mode = #tpu.pipeline_mode<synchronous>, transform_indices = @transform_3, window_bounds = array<i64: 32, 96>}, {pipeline_mode = #tpu.pipeline_mode<synchronous>, transform_indices = @transform_4, window_bounds = array<i64: 1, 96>}, {transform_indices = @transform_5, window_bounds = array<i64: 1, 8, 32>}, {transform_indices = @transform_6, window_bounds = array<i64: 1, 8, 32>}, {transform_indices = @transform_7, window_bounds = array<i64: 1, 8, 32>}]} {
    %c0 = arith.constant 0 : index
    %c0_0 = arith.constant 0 : index
    %c0_1 = arith.constant 0 : index
    %0 = vector.load %arg2[%c0, %c0_0, %c0_1] : memref<1x8x32xf32, #tpu.memory_space<vmem>>, vector<1x8x32xf32>
    %1 = vector.shape_cast %0 : vector<1x8x32xf32> to vector<8x32xf32>
    %c0_2 = arith.constant 0 : index
    %c0_3 = arith.constant 0 : index
    %2 = vector.load %arg3[%c0_2, %c0_3] : memref<1x32xf32, #tpu.memory_space<vmem>>, vector<1x32xf32>
    %3 = vector.shape_cast %2 : vector<1x32xf32> to vector<32xf32>
    %c0_4 = arith.constant 0 : index
    %c0_5 = arith.constant 0 : index
    %4 = vector.load %arg4[%c0_4, %c0_5] : memref<1x32xf32, #tpu.memory_space<vmem>>, vector<1x32xf32>
    %5 = vector.shape_cast %4 : vector<1x32xf32> to vector<32xf32>
    %cst = arith.constant dense<0.000000e+00> : vector<8xf32>
    %6 = vector.multi_reduction <add>, %1, %cst [1] : vector<8x32xf32> to vector<8xf32>
    %7 = vector.shape_cast %6 : vector<8xf32> to vector<8x1xf32>
    %cst_6 = arith.constant 3.200000e+01 : f32
    %8 = vector.broadcast %cst_6 : f32 to vector<8x1xf32>
    %9 = arith.divf %7, %8 : vector<8x1xf32>
    %10 = vector.broadcast %9 : vector<8x1xf32> to vector<8x32xf32>
    %11 = arith.subf %1, %10 : vector<8x32xf32>
    %12 = arith.mulf %11, %11 : vector<8x32xf32>
    %cst_7 = arith.constant dense<0.000000e+00> : vector<8xf32>
    %13 = vector.multi_reduction <add>, %12, %cst_7 [1] : vector<8x32xf32> to vector<8xf32>
    %14 = vector.shape_cast %13 : vector<8xf32> to vector<8x1xf32>
    %cst_8 = arith.constant 3.200000e+01 : f32
    %15 = vector.broadcast %cst_8 : f32 to vector<8x1xf32>
    %16 = arith.divf %14, %15 : vector<8x1xf32>
    %17 = vector.broadcast %9 : vector<8x1xf32> to vector<8x32xf32>
    %18 = arith.subf %1, %17 : vector<8x32xf32>
    %cst_9 = arith.constant 9.99999974E-6 : f32
    %19 = vector.broadcast %cst_9 : f32 to vector<8x1xf32>
    %20 = arith.addf %16, %19 : vector<8x1xf32>
    %21 = math.rsqrt %20 : vector<8x1xf32>
    %22 = vector.broadcast %21 : vector<8x1xf32> to vector<8x32xf32>
    %23 = arith.mulf %18, %22 : vector<8x32xf32>
    %24 = vector.shape_cast %3 : vector<32xf32> to vector<1x32xf32>
    %25 = vector.broadcast %24 : vector<1x32xf32> to vector<8x32xf32>
    %26 = arith.mulf %23, %25 : vector<8x32xf32>
    %27 = vector.shape_cast %5 : vector<32xf32> to vector<1x32xf32>
    %28 = vector.broadcast %27 : vector<1x32xf32> to vector<8x32xf32>
    %29 = arith.addf %26, %28 : vector<8x32xf32>
    %30 = arith.truncf %29 : vector<8x32xf32> to vector<8x32xbf16>
    %c0_10 = arith.constant 0 : index
    %c0_11 = arith.constant 0 : index
    %31 = vector.load %arg5[%c0_10, %c0_11] : memref<32x96xbf16, #tpu.memory_space<vmem>>, vector<32x96xbf16>
    %cst_12 = arith.constant dense<0.000000e+00> : vector<8x96xf32>
    %32 = tpu.matmul %30, %31, %cst_12 {dimension_numbers = #tpu.dot_dimension_numbers<[1], [0], [0], [1], [0, 0, 1, 1], [], []>} : vector<8x32xbf16>, vector<32x96xbf16>, vector<8x96xf32> -> vector<8x96xf32>
    %c0_13 = arith.constant 0 : index
    %c0_14 = arith.constant 0 : index
    %33 = vector.load %arg6[%c0_13, %c0_14] : memref<1x96xf32, #tpu.memory_space<vmem>>, vector<1x96xf32>
    %34 = vector.shape_cast %33 : vector<1x96xf32> to vector<96xf32>
    %35 = vector.shape_cast %34 : vector<96xf32> to vector<1x96xf32>
    %36 = vector.broadcast %35 : vector<1x96xf32> to vector<8x96xf32>
    %37 = arith.addf %32, %36 : vector<8x96xf32>
    %38 = arith.truncf %37 : vector<8x96xf32> to vector<8x96xbf16>
    %39 = vector.extract_strided_slice %38 {offsets = [0, 0], sizes = [8, 32], strides = [1, 1]} : vector<8x96xbf16> to vector<8x32xbf16>
    %c0_15 = arith.constant 0 : index
    %c0_16 = arith.constant 0 : index
    %c0_17 = arith.constant 0 : index
    %40 = vector.load %arg7[%c0_15, %c0_16, %c0_17] : memref<1x8x32xbf16, #tpu.memory_space<vmem>>, vector<1x8x32xbf16>
    %41 = vector.shape_cast %40 : vector<1x8x32xbf16> to vector<8x32xbf16>
    %42 = vector.shape_cast %39 : vector<8x32xbf16> to vector<1x8x32xbf16>
    tpu.vector_store %arg7[%c0_15, %c0_16, %c0_17], %42 {strides = array<i32>} : memref<1x8x32xbf16, #tpu.memory_space<vmem>>, vector<1x8x32xbf16>,
    %43 = vector.extract_strided_slice %38 {offsets = [0, 32], sizes = [8, 32], strides = [1, 1]} : vector<8x96xbf16> to vector<8x32xbf16>
    %c0_18 = arith.constant 0 : index
    %c0_19 = arith.constant 0 : index
    %c0_20 = arith.constant 0 : index
    %44 = vector.load %arg8[%c0_18, %c0_19, %c0_20] : memref<1x8x32xbf16, #tpu.memory_space<vmem>>, vector<1x8x32xbf16>
    %45 = vector.shape_cast %44 : vector<1x8x32xbf16> to vector<8x32xbf16>
    %46 = vector.shape_cast %43 : vector<8x32xbf16> to vector<1x8x32xbf16>
    tpu.vector_store %arg8[%c0_18, %c0_19, %c0_20], %46 {strides = array<i32>} : memref<1x8x32xbf16, #tpu.memory_space<vmem>>, vector<1x8x32xbf16>,
    %47 = vector.extract_strided_slice %38 {offsets = [0, 64], sizes = [8, 32], strides = [1, 1]} : vector<8x96xbf16> to vector<8x32xbf16>
    %c0_21 = arith.constant 0 : index
    %c0_22 = arith.constant 0 : index
    %c0_23 = arith.constant 0 : index
    %48 = vector.load %arg9[%c0_21, %c0_22, %c0_23] : memref<1x8x32xbf16, #tpu.memory_space<vmem>>, vector<1x8x32xbf16>
    %49 = vector.shape_cast %48 : vector<1x8x32xbf16> to vector<8x32xbf16>
    %50 = vector.shape_cast %47 : vector<8x32xbf16> to vector<1x8x32xbf16>
    tpu.vector_store %arg9[%c0_21, %c0_22, %c0_23], %50 {strides = array<i32>} : memref<1x8x32xbf16, #tpu.memory_space<vmem>>, vector<1x8x32xbf16>,
    return
  }
  func.func @transform_0(%arg0: i32, %arg1: i32) -> (i32, i32, i32) {
    %c0_i32 = arith.constant 0 : i32
    %c0_i32_0 = arith.constant 0 : i32
    return %arg0, %arg1, %c0_i32 : i32, i32, i32
  }
  func.func @transform_1(%arg0: i32, %arg1: i32) -> (i32, i32) {
    %c0_i32 = arith.constant 0 : i32
    %c0_i32_0 = arith.constant 0 : i32
    %c0_i32_1 = arith.constant 0 : i32
    return %c0_i32, %c0_i32_0 : i32, i32
  }
  func.func @transform_2(%arg0: i32, %arg1: i32) -> (i32, i32) {
    %c0_i32 = arith.constant 0 : i32
    %c0_i32_0 = arith.constant 0 : i32
    %c0_i32_1 = arith.constant 0 : i32
    return %c0_i32, %c0_i32_0 : i32, i32
  }
  func.func @transform_3(%arg0: i32, %arg1: i32) -> (i32, i32) {
    %c0_i32 = arith.constant 0 : i32
    %c0_i32_0 = arith.constant 0 : i32
    %c0_i32_1 = arith.constant 0 : i32
    return %c0_i32, %c0_i32_0 : i32, i32
  }
  func.func @transform_4(%arg0: i32, %arg1: i32) -> (i32, i32) {
    %c0_i32 = arith.constant 0 : i32
    %c0_i32_0 = arith.constant 0 : i32
    %c0_i32_1 = arith.constant 0 : i32
    return %c0_i32, %c0_i32_0 : i32, i32
  }
  func.func @transform_5(%arg0: i32, %arg1: i32) -> (i32, i32, i32) {
    %c0_i32 = arith.constant 0 : i32
    %c0_i32_0 = arith.constant 0 : i32
    return %arg0, %arg1, %c0_i32 : i32, i32, i32
  }
  func.func @transform_6(%arg0: i32, %arg1: i32) -> (i32, i32, i32) {
    %c0_i32 = arith.constant 0 : i32
    %c0_i32_0 = arith.constant 0 : i32
    return %arg0, %arg1, %c0_i32 : i32, i32, i32
  }
  func.func @transform_7(%arg0: i32, %arg1: i32) -> (i32, i32, i32) {
    %c0_i32 = arith.constant 0 : i32
    %c0_i32_0 = arith.constant 0 : i32
    return %arg0, %arg1, %c0_i32 : i32, i32, i32
  }
}

module attributes {stable_mosaic.version = 11 : i64} {
  func.func @proj_ffn_kernel(%arg0: i32, %arg1: i32, %arg2: memref<1x8x32xf32, #tpu.memory_space<vmem>>, %arg3: memref<1x8x32xbf16, #tpu.memory_space<vmem>>, %arg4: memref<32x32xbf16, #tpu.memory_space<vmem>>, %arg5: memref<1x32xf32, #tpu.memory_space<vmem>>, %arg6: memref<1x32xf32, #tpu.memory_space<vmem>>, %arg7: memref<1x32xf32, #tpu.memory_space<vmem>>, %arg8: memref<32x128xbf16, #tpu.memory_space<vmem>>, %arg9: memref<1x128xf32, #tpu.memory_space<vmem>>, %arg10: memref<128x32xbf16, #tpu.memory_space<vmem>>, %arg11: memref<1x32xf32, #tpu.memory_space<vmem>>, %arg12: memref<1x8x32xf32, #tpu.memory_space<vmem>>) attributes {dimension_semantics = [#tpu.dimension_semantics<parallel>, #tpu.dimension_semantics<parallel>], iteration_bounds = array<i64: 2, 1>, scalar_prefetch = 0 : i64, scratch_operands = 0 : i64, tpu.core_type = #tpu.core_type<tc>, window_params = [{transform_indices = @transform_0, window_bounds = array<i64: 1, 8, 32>}, {transform_indices = @transform_1, window_bounds = array<i64: 1, 8, 32>}, {pipeline_mode = #tpu.pipeline_mode<synchronous>, transform_indices = @transform_2, window_bounds = array<i64: 32, 32>}, {pipeline_mode = #tpu.pipeline_mode<synchronous>, transform_indices = @transform_3, window_bounds = array<i64: 1, 32>}, {pipeline_mode = #tpu.pipeline_mode<synchronous>, transform_indices = @transform_4, window_bounds = array<i64: 1, 32>}, {pipeline_mode = #tpu.pipeline_mode<synchronous>, transform_indices = @transform_5, window_bounds = array<i64: 1, 32>}, {pipeline_mode = #tpu.pipeline_mode<synchronous>, transform_indices = @transform_6, window_bounds = array<i64: 32, 128>}, {pipeline_mode = #tpu.pipeline_mode<synchronous>, transform_indices = @transform_7, window_bounds = array<i64: 1, 128>}, {pipeline_mode = #tpu.pipeline_mode<synchronous>, transform_indices = @transform_8, window_bounds = array<i64: 128, 32>}, {pipeline_mode = #tpu.pipeline_mode<synchronous>, transform_indices = @transform_9, window_bounds = array<i64: 1, 32>}, {transform_indices = @transform_10, window_bounds = array<i64: 1, 8, 32>}]} {
    %c0 = arith.constant 0 : index
    %c0_0 = arith.constant 0 : index
    %c0_1 = arith.constant 0 : index
    %0 = vector.load %arg2[%c0, %c0_0, %c0_1] : memref<1x8x32xf32, #tpu.memory_space<vmem>>, vector<1x8x32xf32>
    %1 = vector.shape_cast %0 : vector<1x8x32xf32> to vector<8x32xf32>
    %c0_2 = arith.constant 0 : index
    %c0_3 = arith.constant 0 : index
    %c0_4 = arith.constant 0 : index
    %2 = vector.load %arg3[%c0_2, %c0_3, %c0_4] : memref<1x8x32xbf16, #tpu.memory_space<vmem>>, vector<1x8x32xbf16>
    %3 = vector.shape_cast %2 : vector<1x8x32xbf16> to vector<8x32xbf16>
    %c0_5 = arith.constant 0 : index
    %c0_6 = arith.constant 0 : index
    %4 = vector.load %arg4[%c0_5, %c0_6] : memref<32x32xbf16, #tpu.memory_space<vmem>>, vector<32x32xbf16>
    %cst = arith.constant dense<0.000000e+00> : vector<8x32xf32>
    %5 = tpu.matmul %3, %4, %cst {dimension_numbers = #tpu.dot_dimension_numbers<[1], [0], [0], [1], [0, 0, 1, 1], [], []>} : vector<8x32xbf16>, vector<32x32xbf16>, vector<8x32xf32> -> vector<8x32xf32>
    %c0_7 = arith.constant 0 : index
    %c0_8 = arith.constant 0 : index
    %6 = vector.load %arg5[%c0_7, %c0_8] : memref<1x32xf32, #tpu.memory_space<vmem>>, vector<1x32xf32>
    %7 = vector.shape_cast %6 : vector<1x32xf32> to vector<32xf32>
    %8 = vector.shape_cast %7 : vector<32xf32> to vector<1x32xf32>
    %9 = vector.broadcast %8 : vector<1x32xf32> to vector<8x32xf32>
    %10 = arith.addf %5, %9 : vector<8x32xf32>
    %11 = arith.addf %1, %10 : vector<8x32xf32>
    %c0_9 = arith.constant 0 : index
    %c0_10 = arith.constant 0 : index
    %12 = vector.load %arg6[%c0_9, %c0_10] : memref<1x32xf32, #tpu.memory_space<vmem>>, vector<1x32xf32>
    %13 = vector.shape_cast %12 : vector<1x32xf32> to vector<32xf32>
    %c0_11 = arith.constant 0 : index
    %c0_12 = arith.constant 0 : index
    %14 = vector.load %arg7[%c0_11, %c0_12] : memref<1x32xf32, #tpu.memory_space<vmem>>, vector<1x32xf32>
    %15 = vector.shape_cast %14 : vector<1x32xf32> to vector<32xf32>
    %cst_13 = arith.constant dense<0.000000e+00> : vector<8xf32>
    %16 = vector.multi_reduction <add>, %11, %cst_13 [1] : vector<8x32xf32> to vector<8xf32>
    %17 = vector.shape_cast %16 : vector<8xf32> to vector<8x1xf32>
    %cst_14 = arith.constant 3.200000e+01 : f32
    %18 = vector.broadcast %cst_14 : f32 to vector<8x1xf32>
    %19 = arith.divf %17, %18 : vector<8x1xf32>
    %20 = vector.broadcast %19 : vector<8x1xf32> to vector<8x32xf32>
    %21 = arith.subf %11, %20 : vector<8x32xf32>
    %22 = arith.mulf %21, %21 : vector<8x32xf32>
    %cst_15 = arith.constant dense<0.000000e+00> : vector<8xf32>
    %23 = vector.multi_reduction <add>, %22, %cst_15 [1] : vector<8x32xf32> to vector<8xf32>
    %24 = vector.shape_cast %23 : vector<8xf32> to vector<8x1xf32>
    %cst_16 = arith.constant 3.200000e+01 : f32
    %25 = vector.broadcast %cst_16 : f32 to vector<8x1xf32>
    %26 = arith.divf %24, %25 : vector<8x1xf32>
    %27 = vector.broadcast %19 : vector<8x1xf32> to vector<8x32xf32>
    %28 = arith.subf %11, %27 : vector<8x32xf32>
    %cst_17 = arith.constant 9.99999974E-6 : f32
    %29 = vector.broadcast %cst_17 : f32 to vector<8x1xf32>
    %30 = arith.addf %26, %29 : vector<8x1xf32>
    %31 = math.rsqrt %30 : vector<8x1xf32>
    %32 = vector.broadcast %31 : vector<8x1xf32> to vector<8x32xf32>
    %33 = arith.mulf %28, %32 : vector<8x32xf32>
    %34 = vector.shape_cast %13 : vector<32xf32> to vector<1x32xf32>
    %35 = vector.broadcast %34 : vector<1x32xf32> to vector<8x32xf32>
    %36 = arith.mulf %33, %35 : vector<8x32xf32>
    %37 = vector.shape_cast %15 : vector<32xf32> to vector<1x32xf32>
    %38 = vector.broadcast %37 : vector<1x32xf32> to vector<8x32xf32>
    %39 = arith.addf %36, %38 : vector<8x32xf32>
    %40 = arith.truncf %39 : vector<8x32xf32> to vector<8x32xbf16>
    %c0_18 = arith.constant 0 : index
    %c0_19 = arith.constant 0 : index
    %41 = vector.load %arg8[%c0_18, %c0_19] : memref<32x128xbf16, #tpu.memory_space<vmem>>, vector<32x128xbf16>
    %cst_20 = arith.constant dense<0.000000e+00> : vector<8x128xf32>
    %42 = tpu.matmul %40, %41, %cst_20 {dimension_numbers = #tpu.dot_dimension_numbers<[1], [0], [0], [1], [0, 0, 1, 1], [], []>} : vector<8x32xbf16>, vector<32x128xbf16>, vector<8x128xf32> -> vector<8x128xf32>
    %c0_21 = arith.constant 0 : index
    %c0_22 = arith.constant 0 : index
    %43 = vector.load %arg9[%c0_21, %c0_22] : memref<1x128xf32, #tpu.memory_space<vmem>>, vector<1x128xf32>
    %44 = vector.shape_cast %43 : vector<1x128xf32> to vector<128xf32>
    %45 = vector.shape_cast %44 : vector<128xf32> to vector<1x128xf32>
    %46 = vector.broadcast %45 : vector<1x128xf32> to vector<8x128xf32>
    %47 = arith.addf %42, %46 : vector<8x128xf32>
    %48 = arith.mulf %47, %47 : vector<8x128xf32>
    %49 = arith.mulf %47, %48 : vector<8x128xf32>
    %cst_23 = arith.constant 4.471500e-02 : f32
    %50 = vector.broadcast %cst_23 : f32 to vector<8x128xf32>
    %51 = arith.mulf %50, %49 : vector<8x128xf32>
    %52 = arith.addf %47, %51 : vector<8x128xf32>
    %cst_24 = arith.constant 0.797884583 : f32
    %53 = vector.broadcast %cst_24 : f32 to vector<8x128xf32>
    %54 = arith.mulf %53, %52 : vector<8x128xf32>
    %55 = math.tanh %54 : vector<8x128xf32>
    %cst_25 = arith.constant 1.000000e+00 : f32
    %56 = vector.broadcast %cst_25 : f32 to vector<8x128xf32>
    %57 = arith.addf %56, %55 : vector<8x128xf32>
    %cst_26 = arith.constant 5.000000e-01 : f32
    %58 = vector.broadcast %cst_26 : f32 to vector<8x128xf32>
    %59 = arith.mulf %58, %57 : vector<8x128xf32>
    %60 = arith.mulf %47, %59 : vector<8x128xf32>
    %61 = arith.truncf %60 : vector<8x128xf32> to vector<8x128xbf16>
    %c0_27 = arith.constant 0 : index
    %c0_28 = arith.constant 0 : index
    %62 = vector.load %arg10[%c0_27, %c0_28] : memref<128x32xbf16, #tpu.memory_space<vmem>>, vector<128x32xbf16>
    %cst_29 = arith.constant dense<0.000000e+00> : vector<8x32xf32>
    %63 = tpu.matmul %61, %62, %cst_29 {dimension_numbers = #tpu.dot_dimension_numbers<[1], [0], [0], [1], [0, 0, 1, 1], [], []>} : vector<8x128xbf16>, vector<128x32xbf16>, vector<8x32xf32> -> vector<8x32xf32>
    %c0_30 = arith.constant 0 : index
    %c0_31 = arith.constant 0 : index
    %64 = vector.load %arg11[%c0_30, %c0_31] : memref<1x32xf32, #tpu.memory_space<vmem>>, vector<1x32xf32>
    %65 = vector.shape_cast %64 : vector<1x32xf32> to vector<32xf32>
    %66 = vector.shape_cast %65 : vector<32xf32> to vector<1x32xf32>
    %67 = vector.broadcast %66 : vector<1x32xf32> to vector<8x32xf32>
    %68 = arith.addf %63, %67 : vector<8x32xf32>
    %69 = arith.addf %11, %68 : vector<8x32xf32>
    %c0_32 = arith.constant 0 : index
    %c0_33 = arith.constant 0 : index
    %c0_34 = arith.constant 0 : index
    %70 = vector.load %arg12[%c0_32, %c0_33, %c0_34] : memref<1x8x32xf32, #tpu.memory_space<vmem>>, vector<1x8x32xf32>
    %71 = vector.shape_cast %70 : vector<1x8x32xf32> to vector<8x32xf32>
    %72 = vector.shape_cast %69 : vector<8x32xf32> to vector<1x8x32xf32>
    tpu.vector_store %arg12[%c0_32, %c0_33, %c0_34], %72 {strides = array<i32>} : memref<1x8x32xf32, #tpu.memory_space<vmem>>, vector<1x8x32xf32>,
    return
  }
  func.func @transform_0(%arg0: i32, %arg1: i32) -> (i32, i32, i32) {
    %c0_i32 = arith.constant 0 : i32
    %c0_i32_0 = arith.constant 0 : i32
    return %arg0, %arg1, %c0_i32 : i32, i32, i32
  }
  func.func @transform_1(%arg0: i32, %arg1: i32) -> (i32, i32, i32) {
    %c0_i32 = arith.constant 0 : i32
    %c0_i32_0 = arith.constant 0 : i32
    return %arg0, %arg1, %c0_i32 : i32, i32, i32
  }
  func.func @transform_2(%arg0: i32, %arg1: i32) -> (i32, i32) {
    %c0_i32 = arith.constant 0 : i32
    %c0_i32_0 = arith.constant 0 : i32
    %c0_i32_1 = arith.constant 0 : i32
    return %c0_i32, %c0_i32_0 : i32, i32
  }
  func.func @transform_3(%arg0: i32, %arg1: i32) -> (i32, i32) {
    %c0_i32 = arith.constant 0 : i32
    %c0_i32_0 = arith.constant 0 : i32
    %c0_i32_1 = arith.constant 0 : i32
    return %c0_i32, %c0_i32_0 : i32, i32
  }
  func.func @transform_4(%arg0: i32, %arg1: i32) -> (i32, i32) {
    %c0_i32 = arith.constant 0 : i32
    %c0_i32_0 = arith.constant 0 : i32
    %c0_i32_1 = arith.constant 0 : i32
    return %c0_i32, %c0_i32_0 : i32, i32
  }
  func.func @transform_5(%arg0: i32, %arg1: i32) -> (i32, i32) {
    %c0_i32 = arith.constant 0 : i32
    %c0_i32_0 = arith.constant 0 : i32
    %c0_i32_1 = arith.constant 0 : i32
    return %c0_i32, %c0_i32_0 : i32, i32
  }
  func.func @transform_6(%arg0: i32, %arg1: i32) -> (i32, i32) {
    %c0_i32 = arith.constant 0 : i32
    %c0_i32_0 = arith.constant 0 : i32
    %c0_i32_1 = arith.constant 0 : i32
    return %c0_i32, %c0_i32_0 : i32, i32
  }
  func.func @transform_7(%arg0: i32, %arg1: i32) -> (i32, i32) {
    %c0_i32 = arith.constant 0 : i32
    %c0_i32_0 = arith.constant 0 : i32
    %c0_i32_1 = arith.constant 0 : i32
    return %c0_i32, %c0_i32_0 : i32, i32
  }
  func.func @transform_8(%arg0: i32, %arg1: i32) -> (i32, i32) {
    %c0_i32 = arith.constant 0 : i32
    %c0_i32_0 = arith.constant 0 : i32
    %c0_i32_1 = arith.constant 0 : i32
    return %c0_i32, %c0_i32_0 : i32, i32
  }
  func.func @transform_9(%arg0: i32, %arg1: i32) -> (i32, i32) {
    %c0_i32 = arith.constant 0 : i32
    %c0_i32_0 = arith.constant 0 : i32
    %c0_i32_1 = arith.constant 0 : i32
    return %c0_i32, %c0_i32_0 : i32, i32
  }
  func.func @transform_10(%arg0: i32, %arg1: i32) -> (i32, i32, i32) {
    %c0_i32 = arith.constant 0 : i32
    %c0_i32_0 = arith.constant 0 : i32
    return %arg0, %arg1, %c0_i32 : i32, i32, i32
  }
}

module attributes {stable_mosaic.version = 11 : i64} {
  func.func @flash_attn_kernel(%arg0: i32, %arg1: i32, %arg2: i32, %arg3: memref<1x8x32xbf16, #tpu.memory_space<vmem>>, %arg4: memref<1x8x32xbf16, #tpu.memory_space<vmem>>, %arg5: memref<1x8x32xbf16, #tpu.memory_space<vmem>>, %arg6: memref<1x8x32xbf16, #tpu.memory_space<vmem>>, %arg7: memref<4x8x1xf32, #tpu.memory_space<vmem>>, %arg8: memref<4x8x1xf32, #tpu.memory_space<vmem>>, %arg9: memref<4x8x8xf32, #tpu.memory_space<vmem>>) attributes {dimension_semantics = [#tpu.dimension_semantics<parallel>, #tpu.dimension_semantics<parallel>, #tpu.dimension_semantics<arbitrary>], iteration_bounds = array<i64: 2, 1, 1>, scalar_prefetch = 0 : i64, scratch_operands = 3 : i64, tpu.core_type = #tpu.core_type<tc>, window_params = [{transform_indices = @transform_0, window_bounds = array<i64: 1, 8, 32>}, {transform_indices = @transform_1, window_bounds = array<i64: 1, 8, 32>}, {transform_indices = @transform_2, window_bounds = array<i64: 1, 8, 32>}, {transform_indices = @transform_3, window_bounds = array<i64: 1, 8, 32>}]} {
    %c0_i32 = arith.constant 0 : i32
    %0 = arith.cmpi eq, %arg2, %c0_i32 : i32
    %1 = arith.extui %0 : i1 to i32
    %c0_i32_0 = arith.constant 0 : i32
    %2 = arith.cmpi ne, %1, %c0_i32_0 : i32
    scf.if %2 {
      %cst = arith.constant -1.000000e+30 : f32
      %12 = vector.broadcast %cst : f32 to vector<4x8x1xf32>
      %c0 = arith.constant 0 : index
      %c0_5 = arith.constant 0 : index
      %c0_6 = arith.constant 0 : index
      %13 = vector.load %arg7[%c0, %c0_5, %c0_6] : memref<4x8x1xf32, #tpu.memory_space<vmem>>, vector<4x8x1xf32>
      tpu.vector_store %arg7[%c0, %c0_5, %c0_6], %12 {strides = array<i32>} : memref<4x8x1xf32, #tpu.memory_space<vmem>>, vector<4x8x1xf32>,
      %cst_7 = arith.constant 0.000000e+00 : f32
      %14 = vector.broadcast %cst_7 : f32 to vector<4x8x1xf32>
      %c0_8 = arith.constant 0 : index
      %c0_9 = arith.constant 0 : index
      %c0_10 = arith.constant 0 : index
      %15 = vector.load %arg8[%c0_8, %c0_9, %c0_10] : memref<4x8x1xf32, #tpu.memory_space<vmem>>, vector<4x8x1xf32>
      tpu.vector_store %arg8[%c0_8, %c0_9, %c0_10], %14 {strides = array<i32>} : memref<4x8x1xf32, #tpu.memory_space<vmem>>, vector<4x8x1xf32>,
      %cst_11 = arith.constant 0.000000e+00 : f32
      %16 = vector.broadcast %cst_11 : f32 to vector<4x8x8xf32>
      %c0_12 = arith.constant 0 : index
      %c0_13 = arith.constant 0 : index
      %c0_14 = arith.constant 0 : index
      %17 = vector.load %arg9[%c0_12, %c0_13, %c0_14] : memref<4x8x8xf32, #tpu.memory_space<vmem>>, vector<4x8x8xf32>
      tpu.vector_store %arg9[%c0_12, %c0_13, %c0_14], %16 {strides = array<i32>} : memref<4x8x8xf32, #tpu.memory_space<vmem>>, vector<4x8x8xf32>,
    } else {
    }
    %3 = arith.cmpi slt, %arg2, %arg1 : i32
    %4 = arith.extui %3 : i1 to i32
    %c0_i32_1 = arith.constant 0 : i32
    %5 = arith.cmpi ne, %4, %c0_i32_1 : i32
    scf.if %5 {
      %c0 = arith.constant 0 : index
      %c0_5 = arith.constant 0 : index
      %c0_6 = arith.constant 0 : index
      %12 = vector.load %arg3[%c0, %c0_5, %c0_6] : memref<1x8x32xbf16, #tpu.memory_space<vmem>>, vector<1x8x32xbf16>
      %13 = vector.shape_cast %12 : vector<1x8x32xbf16> to vector<8x32xbf16>
      %c0_7 = arith.constant 0 : index
      %c0_8 = arith.constant 0 : index
      %c0_9 = arith.constant 0 : index
      %14 = vector.load %arg4[%c0_7, %c0_8, %c0_9] : memref<1x8x32xbf16, #tpu.memory_space<vmem>>, vector<1x8x32xbf16>
      %15 = vector.shape_cast %14 : vector<1x8x32xbf16> to vector<8x32xbf16>
      %c0_10 = arith.constant 0 : index
      %c0_11 = arith.constant 0 : index
      %c0_12 = arith.constant 0 : index
      %16 = vector.load %arg5[%c0_10, %c0_11, %c0_12] : memref<1x8x32xbf16, #tpu.memory_space<vmem>>, vector<1x8x32xbf16>
      %17 = vector.shape_cast %16 : vector<1x8x32xbf16> to vector<8x32xbf16>
      %18 = vector.extract_strided_slice %13 {offsets = [0, 0], sizes = [8, 8], strides = [1, 1]} : vector<8x32xbf16> to vector<8x8xbf16>
      %19 = vector.extract_strided_slice %15 {offsets = [0, 0], sizes = [8, 8], strides = [1, 1]} : vector<8x32xbf16> to vector<8x8xbf16>
      %cst = arith.constant dense<0.000000e+00> : vector<8x8xf32>
      %20 = tpu.matmul %18, %19, %cst {dimension_numbers = #tpu.dot_dimension_numbers<[1], [1], [0], [0], [0, 0, 1, 0], [], []>} : vector<8x8xbf16>, vector<8x8xbf16>, vector<8x8xf32> -> vector<8x8xf32>
      %cst_13 = arith.constant 0.353553385 : f32
      %21 = vector.broadcast %cst_13 : f32 to vector<8x8xf32>
      %22 = arith.mulf %20, %21 : vector<8x8xf32>
      %c0_14 = arith.constant 0 : index
      %c0_15 = arith.constant 0 : index
      %c0_16 = arith.constant 0 : index
      %23 = vector.load %arg7[%c0_14, %c0_15, %c0_16] : memref<4x8x1xf32, #tpu.memory_space<vmem>>, vector<1x8x1xf32>
      %24 = vector.shape_cast %23 : vector<1x8x1xf32> to vector<8x1xf32>
      %cst_17 = arith.constant dense<0xFF800000> : vector<8xf32>
      %25 = vector.multi_reduction <maximumf>, %22, %cst_17 [1] : vector<8x8xf32> to vector<8xf32>
      %26 = vector.shape_cast %25 : vector<8xf32> to vector<8x1xf32>
      %27 = arith.maximumf %24, %26 : vector<8x1xf32>
      %28 = arith.subf %24, %27 : vector<8x1xf32>
      %29 = math.exp %28 : vector<8x1xf32>
      %30 = vector.broadcast %27 : vector<8x1xf32> to vector<8x8xf32>
      %31 = arith.subf %22, %30 : vector<8x8xf32>
      %32 = math.exp %31 : vector<8x8xf32>
      %c0_18 = arith.constant 0 : index
      %c0_19 = arith.constant 0 : index
      %c0_20 = arith.constant 0 : index
      %33 = vector.load %arg8[%c0_18, %c0_19, %c0_20] : memref<4x8x1xf32, #tpu.memory_space<vmem>>, vector<1x8x1xf32>
      %34 = vector.shape_cast %33 : vector<1x8x1xf32> to vector<8x1xf32>
      %35 = arith.mulf %29, %34 : vector<8x1xf32>
      %cst_21 = arith.constant dense<0.000000e+00> : vector<8xf32>
      %36 = vector.multi_reduction <add>, %32, %cst_21 [1] : vector<8x8xf32> to vector<8xf32>
      %37 = vector.shape_cast %36 : vector<8xf32> to vector<8x1xf32>
      %38 = arith.addf %35, %37 : vector<8x1xf32>
      %c0_22 = arith.constant 0 : index
      %c0_23 = arith.constant 0 : index
      %c0_24 = arith.constant 0 : index
      %39 = vector.load %arg8[%c0_22, %c0_23, %c0_24] : memref<4x8x1xf32, #tpu.memory_space<vmem>>, vector<1x8x1xf32>
      %40 = vector.shape_cast %39 : vector<1x8x1xf32> to vector<8x1xf32>
      %41 = vector.shape_cast %38 : vector<8x1xf32> to vector<1x8x1xf32>
      tpu.vector_store %arg8[%c0_22, %c0_23, %c0_24], %41 {strides = array<i32>} : memref<4x8x1xf32, #tpu.memory_space<vmem>>, vector<1x8x1xf32>,
      %c0_25 = arith.constant 0 : index
      %c0_26 = arith.constant 0 : index
      %c0_27 = arith.constant 0 : index
      %42 = vector.load %arg9[%c0_25, %c0_26, %c0_27] : memref<4x8x8xf32, #tpu.memory_space<vmem>>, vector<1x8x8xf32>
      %43 = vector.shape_cast %42 : vector<1x8x8xf32> to vector<8x8xf32>
      %44 = vector.broadcast %29 : vector<8x1xf32> to vector<8x8xf32>
      %45 = arith.mulf %44, %43 : vector<8x8xf32>
      %46 = arith.truncf %32 : vector<8x8xf32> to vector<8x8xbf16>
      %47 = vector.extract_strided_slice %17 {offsets = [0, 0], sizes = [8, 8], strides = [1, 1]} : vector<8x32xbf16> to vector<8x8xbf16>
      %cst_28 = arith.constant dense<0.000000e+00> : vector<8x8xf32>
      %48 = tpu.matmul %46, %47, %cst_28 {dimension_numbers = #tpu.dot_dimension_numbers<[1], [0], [0], [1], [0, 0, 1, 1], [], []>} : vector<8x8xbf16>, vector<8x8xbf16>, vector<8x8xf32> -> vector<8x8xf32>
      %49 = arith.addf %45, %48 : vector<8x8xf32>
      %c0_29 = arith.constant 0 : index
      %c0_30 = arith.constant 0 : index
      %c0_31 = arith.constant 0 : index
      %50 = vector.load %arg9[%c0_29, %c0_30, %c0_31] : memref<4x8x8xf32, #tpu.memory_space<vmem>>, vector<1x8x8xf32>
      %51 = vector.shape_cast %50 : vector<1x8x8xf32> to vector<8x8xf32>
      %52 = vector.shape_cast %49 : vector<8x8xf32> to vector<1x8x8xf32>
      tpu.vector_store %arg9[%c0_29, %c0_30, %c0_31], %52 {strides = array<i32>} : memref<4x8x8xf32, #tpu.memory_space<vmem>>, vector<1x8x8xf32>,
      %c0_32 = arith.constant 0 : index
      %c0_33 = arith.constant 0 : index
      %c0_34 = arith.constant 0 : index
      %53 = vector.load %arg7[%c0_32, %c0_33, %c0_34] : memref<4x8x1xf32, #tpu.memory_space<vmem>>, vector<1x8x1xf32>
      %54 = vector.shape_cast %53 : vector<1x8x1xf32> to vector<8x1xf32>
      %55 = vector.shape_cast %27 : vector<8x1xf32> to vector<1x8x1xf32>
      tpu.vector_store %arg7[%c0_32, %c0_33, %c0_34], %55 {strides = array<i32>} : memref<4x8x1xf32, #tpu.memory_space<vmem>>, vector<1x8x1xf32>,
      %56 = vector.extract_strided_slice %13 {offsets = [0, 8], sizes = [8, 8], strides = [1, 1]} : vector<8x32xbf16> to vector<8x8xbf16>
      %57 = vector.extract_strided_slice %15 {offsets = [0, 8], sizes = [8, 8], strides = [1, 1]} : vector<8x32xbf16> to vector<8x8xbf16>
      %cst_35 = arith.constant dense<0.000000e+00> : vector<8x8xf32>
      %58 = tpu.matmul %56, %57, %cst_35 {dimension_numbers = #tpu.dot_dimension_numbers<[1], [1], [0], [0], [0, 0, 1, 0], [], []>} : vector<8x8xbf16>, vector<8x8xbf16>, vector<8x8xf32> -> vector<8x8xf32>
      %cst_36 = arith.constant 0.353553385 : f32
      %59 = vector.broadcast %cst_36 : f32 to vector<8x8xf32>
      %60 = arith.mulf %58, %59 : vector<8x8xf32>
      %c1 = arith.constant 1 : index
      %c0_37 = arith.constant 0 : index
      %c0_38 = arith.constant 0 : index
      %61 = vector.load %arg7[%c1, %c0_37, %c0_38] : memref<4x8x1xf32, #tpu.memory_space<vmem>>, vector<1x8x1xf32>
      %62 = vector.shape_cast %61 : vector<1x8x1xf32> to vector<8x1xf32>
      %cst_39 = arith.constant dense<0xFF800000> : vector<8xf32>
      %63 = vector.multi_reduction <maximumf>, %60, %cst_39 [1] : vector<8x8xf32> to vector<8xf32>
      %64 = vector.shape_cast %63 : vector<8xf32> to vector<8x1xf32>
      %65 = arith.maximumf %62, %64 : vector<8x1xf32>
      %66 = arith.subf %62, %65 : vector<8x1xf32>
      %67 = math.exp %66 : vector<8x1xf32>
      %68 = vector.broadcast %65 : vector<8x1xf32> to vector<8x8xf32>
      %69 = arith.subf %60, %68 : vector<8x8xf32>
      %70 = math.exp %69 : vector<8x8xf32>
      %c1_40 = arith.constant 1 : index
      %c0_41 = arith.constant 0 : index
      %c0_42 = arith.constant 0 : index
      %71 = vector.load %arg8[%c1_40, %c0_41, %c0_42] : memref<4x8x1xf32, #tpu.memory_space<vmem>>, vector<1x8x1xf32>
      %72 = vector.shape_cast %71 : vector<1x8x1xf32> to vector<8x1xf32>
      %73 = arith.mulf %67, %72 : vector<8x1xf32>
      %cst_43 = arith.constant dense<0.000000e+00> : vector<8xf32>
      %74 = vector.multi_reduction <add>, %70, %cst_43 [1] : vector<8x8xf32> to vector<8xf32>
      %75 = vector.shape_cast %74 : vector<8xf32> to vector<8x1xf32>
      %76 = arith.addf %73, %75 : vector<8x1xf32>
      %c1_44 = arith.constant 1 : index
      %c0_45 = arith.constant 0 : index
      %c0_46 = arith.constant 0 : index
      %77 = vector.load %arg8[%c1_44, %c0_45, %c0_46] : memref<4x8x1xf32, #tpu.memory_space<vmem>>, vector<1x8x1xf32>
      %78 = vector.shape_cast %77 : vector<1x8x1xf32> to vector<8x1xf32>
      %79 = vector.shape_cast %76 : vector<8x1xf32> to vector<1x8x1xf32>
      tpu.vector_store %arg8[%c1_44, %c0_45, %c0_46], %79 {strides = array<i32>} : memref<4x8x1xf32, #tpu.memory_space<vmem>>, vector<1x8x1xf32>,
      %c1_47 = arith.constant 1 : index
      %c0_48 = arith.constant 0 : index
      %c0_49 = arith.constant 0 : index
      %80 = vector.load %arg9[%c1_47, %c0_48, %c0_49] : memref<4x8x8xf32, #tpu.memory_space<vmem>>, vector<1x8x8xf32>
      %81 = vector.shape_cast %80 : vector<1x8x8xf32> to vector<8x8xf32>
      %82 = vector.broadcast %67 : vector<8x1xf32> to vector<8x8xf32>
      %83 = arith.mulf %82, %81 : vector<8x8xf32>
      %84 = arith.truncf %70 : vector<8x8xf32> to vector<8x8xbf16>
      %85 = vector.extract_strided_slice %17 {offsets = [0, 8], sizes = [8, 8], strides = [1, 1]} : vector<8x32xbf16> to vector<8x8xbf16>
      %cst_50 = arith.constant dense<0.000000e+00> : vector<8x8xf32>
      %86 = tpu.matmul %84, %85, %cst_50 {dimension_numbers = #tpu.dot_dimension_numbers<[1], [0], [0], [1], [0, 0, 1, 1], [], []>} : vector<8x8xbf16>, vector<8x8xbf16>, vector<8x8xf32> -> vector<8x8xf32>
      %87 = arith.addf %83, %86 : vector<8x8xf32>
      %c1_51 = arith.constant 1 : index
      %c0_52 = arith.constant 0 : index
      %c0_53 = arith.constant 0 : index
      %88 = vector.load %arg9[%c1_51, %c0_52, %c0_53] : memref<4x8x8xf32, #tpu.memory_space<vmem>>, vector<1x8x8xf32>
      %89 = vector.shape_cast %88 : vector<1x8x8xf32> to vector<8x8xf32>
      %90 = vector.shape_cast %87 : vector<8x8xf32> to vector<1x8x8xf32>
      tpu.vector_store %arg9[%c1_51, %c0_52, %c0_53], %90 {strides = array<i32>} : memref<4x8x8xf32, #tpu.memory_space<vmem>>, vector<1x8x8xf32>,
      %c1_54 = arith.constant 1 : index
      %c0_55 = arith.constant 0 : index
      %c0_56 = arith.constant 0 : index
      %91 = vector.load %arg7[%c1_54, %c0_55, %c0_56] : memref<4x8x1xf32, #tpu.memory_space<vmem>>, vector<1x8x1xf32>
      %92 = vector.shape_cast %91 : vector<1x8x1xf32> to vector<8x1xf32>
      %93 = vector.shape_cast %65 : vector<8x1xf32> to vector<1x8x1xf32>
      tpu.vector_store %arg7[%c1_54, %c0_55, %c0_56], %93 {strides = array<i32>} : memref<4x8x1xf32, #tpu.memory_space<vmem>>, vector<1x8x1xf32>,
      %94 = vector.extract_strided_slice %13 {offsets = [0, 16], sizes = [8, 8], strides = [1, 1]} : vector<8x32xbf16> to vector<8x8xbf16>
      %95 = vector.extract_strided_slice %15 {offsets = [0, 16], sizes = [8, 8], strides = [1, 1]} : vector<8x32xbf16> to vector<8x8xbf16>
      %cst_57 = arith.constant dense<0.000000e+00> : vector<8x8xf32>
      %96 = tpu.matmul %94, %95, %cst_57 {dimension_numbers = #tpu.dot_dimension_numbers<[1], [1], [0], [0], [0, 0, 1, 0], [], []>} : vector<8x8xbf16>, vector<8x8xbf16>, vector<8x8xf32> -> vector<8x8xf32>
      %cst_58 = arith.constant 0.353553385 : f32
      %97 = vector.broadcast %cst_58 : f32 to vector<8x8xf32>
      %98 = arith.mulf %96, %97 : vector<8x8xf32>
      %c2 = arith.constant 2 : index
      %c0_59 = arith.constant 0 : index
      %c0_60 = arith.constant 0 : index
      %99 = vector.load %arg7[%c2, %c0_59, %c0_60] : memref<4x8x1xf32, #tpu.memory_space<vmem>>, vector<1x8x1xf32>
      %100 = vector.shape_cast %99 : vector<1x8x1xf32> to vector<8x1xf32>
      %cst_61 = arith.constant dense<0xFF800000> : vector<8xf32>
      %101 = vector.multi_reduction <maximumf>, %98, %cst_61 [1] : vector<8x8xf32> to vector<8xf32>
      %102 = vector.shape_cast %101 : vector<8xf32> to vector<8x1xf32>
      %103 = arith.maximumf %100, %102 : vector<8x1xf32>
      %104 = arith.subf %100, %103 : vector<8x1xf32>
      %105 = math.exp %104 : vector<8x1xf32>
      %106 = vector.broadcast %103 : vector<8x1xf32> to vector<8x8xf32>
      %107 = arith.subf %98, %106 : vector<8x8xf32>
      %108 = math.exp %107 : vector<8x8xf32>
      %c2_62 = arith.constant 2 : index
      %c0_63 = arith.constant 0 : index
      %c0_64 = arith.constant 0 : index
      %109 = vector.load %arg8[%c2_62, %c0_63, %c0_64] : memref<4x8x1xf32, #tpu.memory_space<vmem>>, vector<1x8x1xf32>
      %110 = vector.shape_cast %109 : vector<1x8x1xf32> to vector<8x1xf32>
      %111 = arith.mulf %105, %110 : vector<8x1xf32>
      %cst_65 = arith.constant dense<0.000000e+00> : vector<8xf32>
      %112 = vector.multi_reduction <add>, %108, %cst_65 [1] : vector<8x8xf32> to vector<8xf32>
      %113 = vector.shape_cast %112 : vector<8xf32> to vector<8x1xf32>
      %114 = arith.addf %111, %113 : vector<8x1xf32>
      %c2_66 = arith.constant 2 : index
      %c0_67 = arith.constant 0 : index
      %c0_68 = arith.constant 0 : index
      %115 = vector.load %arg8[%c2_66, %c0_67, %c0_68] : memref<4x8x1xf32, #tpu.memory_space<vmem>>, vector<1x8x1xf32>
      %116 = vector.shape_cast %115 : vector<1x8x1xf32> to vector<8x1xf32>
      %117 = vector.shape_cast %114 : vector<8x1xf32> to vector<1x8x1xf32>
      tpu.vector_store %arg8[%c2_66, %c0_67, %c0_68], %117 {strides = array<i32>} : memref<4x8x1xf32, #tpu.memory_space<vmem>>, vector<1x8x1xf32>,
      %c2_69 = arith.constant 2 : index
      %c0_70 = arith.constant 0 : index
      %c0_71 = arith.constant 0 : index
      %118 = vector.load %arg9[%c2_69, %c0_70, %c0_71] : memref<4x8x8xf32, #tpu.memory_space<vmem>>, vector<1x8x8xf32>
      %119 = vector.shape_cast %118 : vector<1x8x8xf32> to vector<8x8xf32>
      %120 = vector.broadcast %105 : vector<8x1xf32> to vector<8x8xf32>
      %121 = arith.mulf %120, %119 : vector<8x8xf32>
      %122 = arith.truncf %108 : vector<8x8xf32> to vector<8x8xbf16>
      %123 = vector.extract_strided_slice %17 {offsets = [0, 16], sizes = [8, 8], strides = [1, 1]} : vector<8x32xbf16> to vector<8x8xbf16>
      %cst_72 = arith.constant dense<0.000000e+00> : vector<8x8xf32>
      %124 = tpu.matmul %122, %123, %cst_72 {dimension_numbers = #tpu.dot_dimension_numbers<[1], [0], [0], [1], [0, 0, 1, 1], [], []>} : vector<8x8xbf16>, vector<8x8xbf16>, vector<8x8xf32> -> vector<8x8xf32>
      %125 = arith.addf %121, %124 : vector<8x8xf32>
      %c2_73 = arith.constant 2 : index
      %c0_74 = arith.constant 0 : index
      %c0_75 = arith.constant 0 : index
      %126 = vector.load %arg9[%c2_73, %c0_74, %c0_75] : memref<4x8x8xf32, #tpu.memory_space<vmem>>, vector<1x8x8xf32>
      %127 = vector.shape_cast %126 : vector<1x8x8xf32> to vector<8x8xf32>
      %128 = vector.shape_cast %125 : vector<8x8xf32> to vector<1x8x8xf32>
      tpu.vector_store %arg9[%c2_73, %c0_74, %c0_75], %128 {strides = array<i32>} : memref<4x8x8xf32, #tpu.memory_space<vmem>>, vector<1x8x8xf32>,
      %c2_76 = arith.constant 2 : index
      %c0_77 = arith.constant 0 : index
      %c0_78 = arith.constant 0 : index
      %129 = vector.load %arg7[%c2_76, %c0_77, %c0_78] : memref<4x8x1xf32, #tpu.memory_space<vmem>>, vector<1x8x1xf32>
      %130 = vector.shape_cast %129 : vector<1x8x1xf32> to vector<8x1xf32>
      %131 = vector.shape_cast %103 : vector<8x1xf32> to vector<1x8x1xf32>
      tpu.vector_store %arg7[%c2_76, %c0_77, %c0_78], %131 {strides = array<i32>} : memref<4x8x1xf32, #tpu.memory_space<vmem>>, vector<1x8x1xf32>,
      %132 = vector.extract_strided_slice %13 {offsets = [0, 24], sizes = [8, 8], strides = [1, 1]} : vector<8x32xbf16> to vector<8x8xbf16>
      %133 = vector.extract_strided_slice %15 {offsets = [0, 24], sizes = [8, 8], strides = [1, 1]} : vector<8x32xbf16> to vector<8x8xbf16>
      %cst_79 = arith.constant dense<0.000000e+00> : vector<8x8xf32>
      %134 = tpu.matmul %132, %133, %cst_79 {dimension_numbers = #tpu.dot_dimension_numbers<[1], [1], [0], [0], [0, 0, 1, 0], [], []>} : vector<8x8xbf16>, vector<8x8xbf16>, vector<8x8xf32> -> vector<8x8xf32>
      %cst_80 = arith.constant 0.353553385 : f32
      %135 = vector.broadcast %cst_80 : f32 to vector<8x8xf32>
      %136 = arith.mulf %134, %135 : vector<8x8xf32>
      %c3 = arith.constant 3 : index
      %c0_81 = arith.constant 0 : index
      %c0_82 = arith.constant 0 : index
      %137 = vector.load %arg7[%c3, %c0_81, %c0_82] : memref<4x8x1xf32, #tpu.memory_space<vmem>>, vector<1x8x1xf32>
      %138 = vector.shape_cast %137 : vector<1x8x1xf32> to vector<8x1xf32>
      %cst_83 = arith.constant dense<0xFF800000> : vector<8xf32>
      %139 = vector.multi_reduction <maximumf>, %136, %cst_83 [1] : vector<8x8xf32> to vector<8xf32>
      %140 = vector.shape_cast %139 : vector<8xf32> to vector<8x1xf32>
      %141 = arith.maximumf %138, %140 : vector<8x1xf32>
      %142 = arith.subf %138, %141 : vector<8x1xf32>
      %143 = math.exp %142 : vector<8x1xf32>
      %144 = vector.broadcast %141 : vector<8x1xf32> to vector<8x8xf32>
      %145 = arith.subf %136, %144 : vector<8x8xf32>
      %146 = math.exp %145 : vector<8x8xf32>
      %c3_84 = arith.constant 3 : index
      %c0_85 = arith.constant 0 : index
      %c0_86 = arith.constant 0 : index
      %147 = vector.load %arg8[%c3_84, %c0_85, %c0_86] : memref<4x8x1xf32, #tpu.memory_space<vmem>>, vector<1x8x1xf32>
      %148 = vector.shape_cast %147 : vector<1x8x1xf32> to vector<8x1xf32>
      %149 = arith.mulf %143, %148 : vector<8x1xf32>
      %cst_87 = arith.constant dense<0.000000e+00> : vector<8xf32>
      %150 = vector.multi_reduction <add>, %146, %cst_87 [1] : vector<8x8xf32> to vector<8xf32>
      %151 = vector.shape_cast %150 : vector<8xf32> to vector<8x1xf32>
      %152 = arith.addf %149, %151 : vector<8x1xf32>
      %c3_88 = arith.constant 3 : index
      %c0_89 = arith.constant 0 : index
      %c0_90 = arith.constant 0 : index
      %153 = vector.load %arg8[%c3_88, %c0_89, %c0_90] : memref<4x8x1xf32, #tpu.memory_space<vmem>>, vector<1x8x1xf32>
      %154 = vector.shape_cast %153 : vector<1x8x1xf32> to vector<8x1xf32>
      %155 = vector.shape_cast %152 : vector<8x1xf32> to vector<1x8x1xf32>
      tpu.vector_store %arg8[%c3_88, %c0_89, %c0_90], %155 {strides = array<i32>} : memref<4x8x1xf32, #tpu.memory_space<vmem>>, vector<1x8x1xf32>,
      %c3_91 = arith.constant 3 : index
      %c0_92 = arith.constant 0 : index
      %c0_93 = arith.constant 0 : index
      %156 = vector.load %arg9[%c3_91, %c0_92, %c0_93] : memref<4x8x8xf32, #tpu.memory_space<vmem>>, vector<1x8x8xf32>
      %157 = vector.shape_cast %156 : vector<1x8x8xf32> to vector<8x8xf32>
      %158 = vector.broadcast %143 : vector<8x1xf32> to vector<8x8xf32>
      %159 = arith.mulf %158, %157 : vector<8x8xf32>
      %160 = arith.truncf %146 : vector<8x8xf32> to vector<8x8xbf16>
      %161 = vector.extract_strided_slice %17 {offsets = [0, 24], sizes = [8, 8], strides = [1, 1]} : vector<8x32xbf16> to vector<8x8xbf16>
      %cst_94 = arith.constant dense<0.000000e+00> : vector<8x8xf32>
      %162 = tpu.matmul %160, %161, %cst_94 {dimension_numbers = #tpu.dot_dimension_numbers<[1], [0], [0], [1], [0, 0, 1, 1], [], []>} : vector<8x8xbf16>, vector<8x8xbf16>, vector<8x8xf32> -> vector<8x8xf32>
      %163 = arith.addf %159, %162 : vector<8x8xf32>
      %c3_95 = arith.constant 3 : index
      %c0_96 = arith.constant 0 : index
      %c0_97 = arith.constant 0 : index
      %164 = vector.load %arg9[%c3_95, %c0_96, %c0_97] : memref<4x8x8xf32, #tpu.memory_space<vmem>>, vector<1x8x8xf32>
      %165 = vector.shape_cast %164 : vector<1x8x8xf32> to vector<8x8xf32>
      %166 = vector.shape_cast %163 : vector<8x8xf32> to vector<1x8x8xf32>
      tpu.vector_store %arg9[%c3_95, %c0_96, %c0_97], %166 {strides = array<i32>} : memref<4x8x8xf32, #tpu.memory_space<vmem>>, vector<1x8x8xf32>,
      %c3_98 = arith.constant 3 : index
      %c0_99 = arith.constant 0 : index
      %c0_100 = arith.constant 0 : index
      %167 = vector.load %arg7[%c3_98, %c0_99, %c0_100] : memref<4x8x1xf32, #tpu.memory_space<vmem>>, vector<1x8x1xf32>
      %168 = vector.shape_cast %167 : vector<1x8x1xf32> to vector<8x1xf32>
      %169 = vector.shape_cast %141 : vector<8x1xf32> to vector<1x8x1xf32>
      tpu.vector_store %arg7[%c3_98, %c0_99, %c0_100], %169 {strides = array<i32>} : memref<4x8x1xf32, #tpu.memory_space<vmem>>, vector<1x8x1xf32>,
    } else {
    }
    %6 = arith.cmpi eq, %arg2, %arg1 : i32
    %7 = arith.extui %6 : i1 to i32
    %c0_i32_2 = arith.constant 0 : i32
    %8 = arith.cmpi ne, %7, %c0_i32_2 : i32
    scf.if %8 {
      %c0 = arith.constant 0 : index
      %c0_5 = arith.constant 0 : index
      %c0_6 = arith.constant 0 : index
      %12 = vector.load %arg3[%c0, %c0_5, %c0_6] : memref<1x8x32xbf16, #tpu.memory_space<vmem>>, vector<1x8x32xbf16>
      %13 = vector.shape_cast %12 : vector<1x8x32xbf16> to vector<8x32xbf16>
      %c0_7 = arith.constant 0 : index
      %c0_8 = arith.constant 0 : index
      %c0_9 = arith.constant 0 : index
      %14 = vector.load %arg4[%c0_7, %c0_8, %c0_9] : memref<1x8x32xbf16, #tpu.memory_space<vmem>>, vector<1x8x32xbf16>
      %15 = vector.shape_cast %14 : vector<1x8x32xbf16> to vector<8x32xbf16>
      %c0_10 = arith.constant 0 : index
      %c0_11 = arith.constant 0 : index
      %c0_12 = arith.constant 0 : index
      %16 = vector.load %arg5[%c0_10, %c0_11, %c0_12] : memref<1x8x32xbf16, #tpu.memory_space<vmem>>, vector<1x8x32xbf16>
      %17 = vector.shape_cast %16 : vector<1x8x32xbf16> to vector<8x32xbf16>
      %c8_i32 = arith.constant 8 : i32
      %18 = arith.muli %arg1, %c8_i32 : i32
      %19 = tpu.iota {dimensions = array<i32: 0>} : vector<8x8xi32>
      %20 = vector.broadcast %18 : i32 to vector<8x8xi32>
      %21 = arith.addi %20, %19 : vector<8x8xi32>
      %c8_i32_13 = arith.constant 8 : i32
      %22 = arith.muli %arg2, %c8_i32_13 : i32
      %23 = tpu.iota {dimensions = array<i32: 1>} : vector<8x8xi32>
      %24 = vector.broadcast %22 : i32 to vector<8x8xi32>
      %25 = arith.addi %24, %23 : vector<8x8xi32>
      %26 = arith.cmpi sle, %25, %21 : vector<8x8xi32>
      %27 = vector.extract_strided_slice %13 {offsets = [0, 0], sizes = [8, 8], strides = [1, 1]} : vector<8x32xbf16> to vector<8x8xbf16>
      %28 = vector.extract_strided_slice %15 {offsets = [0, 0], sizes = [8, 8], strides = [1, 1]} : vector<8x32xbf16> to vector<8x8xbf16>
      %cst = arith.constant dense<0.000000e+00> : vector<8x8xf32>
      %29 = tpu.matmul %27, %28, %cst {dimension_numbers = #tpu.dot_dimension_numbers<[1], [1], [0], [0], [0, 0, 1, 0], [], []>} : vector<8x8xbf16>, vector<8x8xbf16>, vector<8x8xf32> -> vector<8x8xf32>
      %cst_14 = arith.constant 0.353553385 : f32
      %30 = vector.broadcast %cst_14 : f32 to vector<8x8xf32>
      %31 = arith.mulf %29, %30 : vector<8x8xf32>
      %cst_15 = arith.constant -1.000000e+30 : f32
      %32 = vector.broadcast %cst_15 : f32 to vector<8x8xf32>
      %33 = arith.select %26, %31, %32 : vector<8x8xi1>, vector<8x8xf32>
      %c0_16 = arith.constant 0 : index
      %c0_17 = arith.constant 0 : index
      %c0_18 = arith.constant 0 : index
      %34 = vector.load %arg7[%c0_16, %c0_17, %c0_18] : memref<4x8x1xf32, #tpu.memory_space<vmem>>, vector<1x8x1xf32>
      %35 = vector.shape_cast %34 : vector<1x8x1xf32> to vector<8x1xf32>
      %cst_19 = arith.constant dense<0xFF800000> : vector<8xf32>
      %36 = vector.multi_reduction <maximumf>, %33, %cst_19 [1] : vector<8x8xf32> to vector<8xf32>
      %37 = vector.shape_cast %36 : vector<8xf32> to vector<8x1xf32>
      %38 = arith.maximumf %35, %37 : vector<8x1xf32>
      %39 = arith.subf %35, %38 : vector<8x1xf32>
      %40 = math.exp %39 : vector<8x1xf32>
      %41 = vector.broadcast %38 : vector<8x1xf32> to vector<8x8xf32>
      %42 = arith.subf %33, %41 : vector<8x8xf32>
      %43 = math.exp %42 : vector<8x8xf32>
      %c0_20 = arith.constant 0 : index
      %c0_21 = arith.constant 0 : index
      %c0_22 = arith.constant 0 : index
      %44 = vector.load %arg8[%c0_20, %c0_21, %c0_22] : memref<4x8x1xf32, #tpu.memory_space<vmem>>, vector<1x8x1xf32>
      %45 = vector.shape_cast %44 : vector<1x8x1xf32> to vector<8x1xf32>
      %46 = arith.mulf %40, %45 : vector<8x1xf32>
      %cst_23 = arith.constant dense<0.000000e+00> : vector<8xf32>
      %47 = vector.multi_reduction <add>, %43, %cst_23 [1] : vector<8x8xf32> to vector<8xf32>
      %48 = vector.shape_cast %47 : vector<8xf32> to vector<8x1xf32>
      %49 = arith.addf %46, %48 : vector<8x1xf32>
      %c0_24 = arith.constant 0 : index
      %c0_25 = arith.constant 0 : index
      %c0_26 = arith.constant 0 : index
      %50 = vector.load %arg8[%c0_24, %c0_25, %c0_26] : memref<4x8x1xf32, #tpu.memory_space<vmem>>, vector<1x8x1xf32>
      %51 = vector.shape_cast %50 : vector<1x8x1xf32> to vector<8x1xf32>
      %52 = vector.shape_cast %49 : vector<8x1xf32> to vector<1x8x1xf32>
      tpu.vector_store %arg8[%c0_24, %c0_25, %c0_26], %52 {strides = array<i32>} : memref<4x8x1xf32, #tpu.memory_space<vmem>>, vector<1x8x1xf32>,
      %c0_27 = arith.constant 0 : index
      %c0_28 = arith.constant 0 : index
      %c0_29 = arith.constant 0 : index
      %53 = vector.load %arg9[%c0_27, %c0_28, %c0_29] : memref<4x8x8xf32, #tpu.memory_space<vmem>>, vector<1x8x8xf32>
      %54 = vector.shape_cast %53 : vector<1x8x8xf32> to vector<8x8xf32>
      %55 = vector.broadcast %40 : vector<8x1xf32> to vector<8x8xf32>
      %56 = arith.mulf %55, %54 : vector<8x8xf32>
      %57 = arith.truncf %43 : vector<8x8xf32> to vector<8x8xbf16>
      %58 = vector.extract_strided_slice %17 {offsets = [0, 0], sizes = [8, 8], strides = [1, 1]} : vector<8x32xbf16> to vector<8x8xbf16>
      %cst_30 = arith.constant dense<0.000000e+00> : vector<8x8xf32>
      %59 = tpu.matmul %57, %58, %cst_30 {dimension_numbers = #tpu.dot_dimension_numbers<[1], [0], [0], [1], [0, 0, 1, 1], [], []>} : vector<8x8xbf16>, vector<8x8xbf16>, vector<8x8xf32> -> vector<8x8xf32>
      %60 = arith.addf %56, %59 : vector<8x8xf32>
      %c0_31 = arith.constant 0 : index
      %c0_32 = arith.constant 0 : index
      %c0_33 = arith.constant 0 : index
      %61 = vector.load %arg9[%c0_31, %c0_32, %c0_33] : memref<4x8x8xf32, #tpu.memory_space<vmem>>, vector<1x8x8xf32>
      %62 = vector.shape_cast %61 : vector<1x8x8xf32> to vector<8x8xf32>
      %63 = vector.shape_cast %60 : vector<8x8xf32> to vector<1x8x8xf32>
      tpu.vector_store %arg9[%c0_31, %c0_32, %c0_33], %63 {strides = array<i32>} : memref<4x8x8xf32, #tpu.memory_space<vmem>>, vector<1x8x8xf32>,
      %c0_34 = arith.constant 0 : index
      %c0_35 = arith.constant 0 : index
      %c0_36 = arith.constant 0 : index
      %64 = vector.load %arg7[%c0_34, %c0_35, %c0_36] : memref<4x8x1xf32, #tpu.memory_space<vmem>>, vector<1x8x1xf32>
      %65 = vector.shape_cast %64 : vector<1x8x1xf32> to vector<8x1xf32>
      %66 = vector.shape_cast %38 : vector<8x1xf32> to vector<1x8x1xf32>
      tpu.vector_store %arg7[%c0_34, %c0_35, %c0_36], %66 {strides = array<i32>} : memref<4x8x1xf32, #tpu.memory_space<vmem>>, vector<1x8x1xf32>,
      %67 = vector.extract_strided_slice %13 {offsets = [0, 8], sizes = [8, 8], strides = [1, 1]} : vector<8x32xbf16> to vector<8x8xbf16>
      %68 = vector.extract_strided_slice %15 {offsets = [0, 8], sizes = [8, 8], strides = [1, 1]} : vector<8x32xbf16> to vector<8x8xbf16>
      %cst_37 = arith.constant dense<0.000000e+00> : vector<8x8xf32>
      %69 = tpu.matmul %67, %68, %cst_37 {dimension_numbers = #tpu.dot_dimension_numbers<[1], [1], [0], [0], [0, 0, 1, 0], [], []>} : vector<8x8xbf16>, vector<8x8xbf16>, vector<8x8xf32> -> vector<8x8xf32>
      %cst_38 = arith.constant 0.353553385 : f32
      %70 = vector.broadcast %cst_38 : f32 to vector<8x8xf32>
      %71 = arith.mulf %69, %70 : vector<8x8xf32>
      %cst_39 = arith.constant -1.000000e+30 : f32
      %72 = vector.broadcast %cst_39 : f32 to vector<8x8xf32>
      %73 = arith.select %26, %71, %72 : vector<8x8xi1>, vector<8x8xf32>
      %c1 = arith.constant 1 : index
      %c0_40 = arith.constant 0 : index
      %c0_41 = arith.constant 0 : index
      %74 = vector.load %arg7[%c1, %c0_40, %c0_41] : memref<4x8x1xf32, #tpu.memory_space<vmem>>, vector<1x8x1xf32>
      %75 = vector.shape_cast %74 : vector<1x8x1xf32> to vector<8x1xf32>
      %cst_42 = arith.constant dense<0xFF800000> : vector<8xf32>
      %76 = vector.multi_reduction <maximumf>, %73, %cst_42 [1] : vector<8x8xf32> to vector<8xf32>
      %77 = vector.shape_cast %76 : vector<8xf32> to vector<8x1xf32>
      %78 = arith.maximumf %75, %77 : vector<8x1xf32>
      %79 = arith.subf %75, %78 : vector<8x1xf32>
      %80 = math.exp %79 : vector<8x1xf32>
      %81 = vector.broadcast %78 : vector<8x1xf32> to vector<8x8xf32>
      %82 = arith.subf %73, %81 : vector<8x8xf32>
      %83 = math.exp %82 : vector<8x8xf32>
      %c1_43 = arith.constant 1 : index
      %c0_44 = arith.constant 0 : index
      %c0_45 = arith.constant 0 : index
      %84 = vector.load %arg8[%c1_43, %c0_44, %c0_45] : memref<4x8x1xf32, #tpu.memory_space<vmem>>, vector<1x8x1xf32>
      %85 = vector.shape_cast %84 : vector<1x8x1xf32> to vector<8x1xf32>
      %86 = arith.mulf %80, %85 : vector<8x1xf32>
      %cst_46 = arith.constant dense<0.000000e+00> : vector<8xf32>
      %87 = vector.multi_reduction <add>, %83, %cst_46 [1] : vector<8x8xf32> to vector<8xf32>
      %88 = vector.shape_cast %87 : vector<8xf32> to vector<8x1xf32>
      %89 = arith.addf %86, %88 : vector<8x1xf32>
      %c1_47 = arith.constant 1 : index
      %c0_48 = arith.constant 0 : index
      %c0_49 = arith.constant 0 : index
      %90 = vector.load %arg8[%c1_47, %c0_48, %c0_49] : memref<4x8x1xf32, #tpu.memory_space<vmem>>, vector<1x8x1xf32>
      %91 = vector.shape_cast %90 : vector<1x8x1xf32> to vector<8x1xf32>
      %92 = vector.shape_cast %89 : vector<8x1xf32> to vector<1x8x1xf32>
      tpu.vector_store %arg8[%c1_47, %c0_48, %c0_49], %92 {strides = array<i32>} : memref<4x8x1xf32, #tpu.memory_space<vmem>>, vector<1x8x1xf32>,
      %c1_50 = arith.constant 1 : index
      %c0_51 = arith.constant 0 : index
      %c0_52 = arith.constant 0 : index
      %93 = vector.load %arg9[%c1_50, %c0_51, %c0_52] : memref<4x8x8xf32, #tpu.memory_space<vmem>>, vector<1x8x8xf32>
      %94 = vector.shape_cast %93 : vector<1x8x8xf32> to vector<8x8xf32>
      %95 = vector.broadcast %80 : vector<8x1xf32> to vector<8x8xf32>
      %96 = arith.mulf %95, %94 : vector<8x8xf32>
      %97 = arith.truncf %83 : vector<8x8xf32> to vector<8x8xbf16>
      %98 = vector.extract_strided_slice %17 {offsets = [0, 8], sizes = [8, 8], strides = [1, 1]} : vector<8x32xbf16> to vector<8x8xbf16>
      %cst_53 = arith.constant dense<0.000000e+00> : vector<8x8xf32>
      %99 = tpu.matmul %97, %98, %cst_53 {dimension_numbers = #tpu.dot_dimension_numbers<[1], [0], [0], [1], [0, 0, 1, 1], [], []>} : vector<8x8xbf16>, vector<8x8xbf16>, vector<8x8xf32> -> vector<8x8xf32>
      %100 = arith.addf %96, %99 : vector<8x8xf32>
      %c1_54 = arith.constant 1 : index
      %c0_55 = arith.constant 0 : index
      %c0_56 = arith.constant 0 : index
      %101 = vector.load %arg9[%c1_54, %c0_55, %c0_56] : memref<4x8x8xf32, #tpu.memory_space<vmem>>, vector<1x8x8xf32>
      %102 = vector.shape_cast %101 : vector<1x8x8xf32> to vector<8x8xf32>
      %103 = vector.shape_cast %100 : vector<8x8xf32> to vector<1x8x8xf32>
      tpu.vector_store %arg9[%c1_54, %c0_55, %c0_56], %103 {strides = array<i32>} : memref<4x8x8xf32, #tpu.memory_space<vmem>>, vector<1x8x8xf32>,
      %c1_57 = arith.constant 1 : index
      %c0_58 = arith.constant 0 : index
      %c0_59 = arith.constant 0 : index
      %104 = vector.load %arg7[%c1_57, %c0_58, %c0_59] : memref<4x8x1xf32, #tpu.memory_space<vmem>>, vector<1x8x1xf32>
      %105 = vector.shape_cast %104 : vector<1x8x1xf32> to vector<8x1xf32>
      %106 = vector.shape_cast %78 : vector<8x1xf32> to vector<1x8x1xf32>
      tpu.vector_store %arg7[%c1_57, %c0_58, %c0_59], %106 {strides = array<i32>} : memref<4x8x1xf32, #tpu.memory_space<vmem>>, vector<1x8x1xf32>,
      %107 = vector.extract_strided_slice %13 {offsets = [0, 16], sizes = [8, 8], strides = [1, 1]} : vector<8x32xbf16> to vector<8x8xbf16>
      %108 = vector.extract_strided_slice %15 {offsets = [0, 16], sizes = [8, 8], strides = [1, 1]} : vector<8x32xbf16> to vector<8x8xbf16>
      %cst_60 = arith.constant dense<0.000000e+00> : vector<8x8xf32>
      %109 = tpu.matmul %107, %108, %cst_60 {dimension_numbers = #tpu.dot_dimension_numbers<[1], [1], [0], [0], [0, 0, 1, 0], [], []>} : vector<8x8xbf16>, vector<8x8xbf16>, vector<8x8xf32> -> vector<8x8xf32>
      %cst_61 = arith.constant 0.353553385 : f32
      %110 = vector.broadcast %cst_61 : f32 to vector<8x8xf32>
      %111 = arith.mulf %109, %110 : vector<8x8xf32>
      %cst_62 = arith.constant -1.000000e+30 : f32
      %112 = vector.broadcast %cst_62 : f32 to vector<8x8xf32>
      %113 = arith.select %26, %111, %112 : vector<8x8xi1>, vector<8x8xf32>
      %c2 = arith.constant 2 : index
      %c0_63 = arith.constant 0 : index
      %c0_64 = arith.constant 0 : index
      %114 = vector.load %arg7[%c2, %c0_63, %c0_64] : memref<4x8x1xf32, #tpu.memory_space<vmem>>, vector<1x8x1xf32>
      %115 = vector.shape_cast %114 : vector<1x8x1xf32> to vector<8x1xf32>
      %cst_65 = arith.constant dense<0xFF800000> : vector<8xf32>
      %116 = vector.multi_reduction <maximumf>, %113, %cst_65 [1] : vector<8x8xf32> to vector<8xf32>
      %117 = vector.shape_cast %116 : vector<8xf32> to vector<8x1xf32>
      %118 = arith.maximumf %115, %117 : vector<8x1xf32>
      %119 = arith.subf %115, %118 : vector<8x1xf32>
      %120 = math.exp %119 : vector<8x1xf32>
      %121 = vector.broadcast %118 : vector<8x1xf32> to vector<8x8xf32>
      %122 = arith.subf %113, %121 : vector<8x8xf32>
      %123 = math.exp %122 : vector<8x8xf32>
      %c2_66 = arith.constant 2 : index
      %c0_67 = arith.constant 0 : index
      %c0_68 = arith.constant 0 : index
      %124 = vector.load %arg8[%c2_66, %c0_67, %c0_68] : memref<4x8x1xf32, #tpu.memory_space<vmem>>, vector<1x8x1xf32>
      %125 = vector.shape_cast %124 : vector<1x8x1xf32> to vector<8x1xf32>
      %126 = arith.mulf %120, %125 : vector<8x1xf32>
      %cst_69 = arith.constant dense<0.000000e+00> : vector<8xf32>
      %127 = vector.multi_reduction <add>, %123, %cst_69 [1] : vector<8x8xf32> to vector<8xf32>
      %128 = vector.shape_cast %127 : vector<8xf32> to vector<8x1xf32>
      %129 = arith.addf %126, %128 : vector<8x1xf32>
      %c2_70 = arith.constant 2 : index
      %c0_71 = arith.constant 0 : index
      %c0_72 = arith.constant 0 : index
      %130 = vector.load %arg8[%c2_70, %c0_71, %c0_72] : memref<4x8x1xf32, #tpu.memory_space<vmem>>, vector<1x8x1xf32>
      %131 = vector.shape_cast %130 : vector<1x8x1xf32> to vector<8x1xf32>
      %132 = vector.shape_cast %129 : vector<8x1xf32> to vector<1x8x1xf32>
      tpu.vector_store %arg8[%c2_70, %c0_71, %c0_72], %132 {strides = array<i32>} : memref<4x8x1xf32, #tpu.memory_space<vmem>>, vector<1x8x1xf32>,
      %c2_73 = arith.constant 2 : index
      %c0_74 = arith.constant 0 : index
      %c0_75 = arith.constant 0 : index
      %133 = vector.load %arg9[%c2_73, %c0_74, %c0_75] : memref<4x8x8xf32, #tpu.memory_space<vmem>>, vector<1x8x8xf32>
      %134 = vector.shape_cast %133 : vector<1x8x8xf32> to vector<8x8xf32>
      %135 = vector.broadcast %120 : vector<8x1xf32> to vector<8x8xf32>
      %136 = arith.mulf %135, %134 : vector<8x8xf32>
      %137 = arith.truncf %123 : vector<8x8xf32> to vector<8x8xbf16>
      %138 = vector.extract_strided_slice %17 {offsets = [0, 16], sizes = [8, 8], strides = [1, 1]} : vector<8x32xbf16> to vector<8x8xbf16>
      %cst_76 = arith.constant dense<0.000000e+00> : vector<8x8xf32>
      %139 = tpu.matmul %137, %138, %cst_76 {dimension_numbers = #tpu.dot_dimension_numbers<[1], [0], [0], [1], [0, 0, 1, 1], [], []>} : vector<8x8xbf16>, vector<8x8xbf16>, vector<8x8xf32> -> vector<8x8xf32>
      %140 = arith.addf %136, %139 : vector<8x8xf32>
      %c2_77 = arith.constant 2 : index
      %c0_78 = arith.constant 0 : index
      %c0_79 = arith.constant 0 : index
      %141 = vector.load %arg9[%c2_77, %c0_78, %c0_79] : memref<4x8x8xf32, #tpu.memory_space<vmem>>, vector<1x8x8xf32>
      %142 = vector.shape_cast %141 : vector<1x8x8xf32> to vector<8x8xf32>
      %143 = vector.shape_cast %140 : vector<8x8xf32> to vector<1x8x8xf32>
      tpu.vector_store %arg9[%c2_77, %c0_78, %c0_79], %143 {strides = array<i32>} : memref<4x8x8xf32, #tpu.memory_space<vmem>>, vector<1x8x8xf32>,
      %c2_80 = arith.constant 2 : index
      %c0_81 = arith.constant 0 : index
      %c0_82 = arith.constant 0 : index
      %144 = vector.load %arg7[%c2_80, %c0_81, %c0_82] : memref<4x8x1xf32, #tpu.memory_space<vmem>>, vector<1x8x1xf32>
      %145 = vector.shape_cast %144 : vector<1x8x1xf32> to vector<8x1xf32>
      %146 = vector.shape_cast %118 : vector<8x1xf32> to vector<1x8x1xf32>
      tpu.vector_store %arg7[%c2_80, %c0_81, %c0_82], %146 {strides = array<i32>} : memref<4x8x1xf32, #tpu.memory_space<vmem>>, vector<1x8x1xf32>,
      %147 = vector.extract_strided_slice %13 {offsets = [0, 24], sizes = [8, 8], strides = [1, 1]} : vector<8x32xbf16> to vector<8x8xbf16>
      %148 = vector.extract_strided_slice %15 {offsets = [0, 24], sizes = [8, 8], strides = [1, 1]} : vector<8x32xbf16> to vector<8x8xbf16>
      %cst_83 = arith.constant dense<0.000000e+00> : vector<8x8xf32>
      %149 = tpu.matmul %147, %148, %cst_83 {dimension_numbers = #tpu.dot_dimension_numbers<[1], [1], [0], [0], [0, 0, 1, 0], [], []>} : vector<8x8xbf16>, vector<8x8xbf16>, vector<8x8xf32> -> vector<8x8xf32>
      %cst_84 = arith.constant 0.353553385 : f32
      %150 = vector.broadcast %cst_84 : f32 to vector<8x8xf32>
      %151 = arith.mulf %149, %150 : vector<8x8xf32>
      %cst_85 = arith.constant -1.000000e+30 : f32
      %152 = vector.broadcast %cst_85 : f32 to vector<8x8xf32>
      %153 = arith.select %26, %151, %152 : vector<8x8xi1>, vector<8x8xf32>
      %c3 = arith.constant 3 : index
      %c0_86 = arith.constant 0 : index
      %c0_87 = arith.constant 0 : index
      %154 = vector.load %arg7[%c3, %c0_86, %c0_87] : memref<4x8x1xf32, #tpu.memory_space<vmem>>, vector<1x8x1xf32>
      %155 = vector.shape_cast %154 : vector<1x8x1xf32> to vector<8x1xf32>
      %cst_88 = arith.constant dense<0xFF800000> : vector<8xf32>
      %156 = vector.multi_reduction <maximumf>, %153, %cst_88 [1] : vector<8x8xf32> to vector<8xf32>
      %157 = vector.shape_cast %156 : vector<8xf32> to vector<8x1xf32>
      %158 = arith.maximumf %155, %157 : vector<8x1xf32>
      %159 = arith.subf %155, %158 : vector<8x1xf32>
      %160 = math.exp %159 : vector<8x1xf32>
      %161 = vector.broadcast %158 : vector<8x1xf32> to vector<8x8xf32>
      %162 = arith.subf %153, %161 : vector<8x8xf32>
      %163 = math.exp %162 : vector<8x8xf32>
      %c3_89 = arith.constant 3 : index
      %c0_90 = arith.constant 0 : index
      %c0_91 = arith.constant 0 : index
      %164 = vector.load %arg8[%c3_89, %c0_90, %c0_91] : memref<4x8x1xf32, #tpu.memory_space<vmem>>, vector<1x8x1xf32>
      %165 = vector.shape_cast %164 : vector<1x8x1xf32> to vector<8x1xf32>
      %166 = arith.mulf %160, %165 : vector<8x1xf32>
      %cst_92 = arith.constant dense<0.000000e+00> : vector<8xf32>
      %167 = vector.multi_reduction <add>, %163, %cst_92 [1] : vector<8x8xf32> to vector<8xf32>
      %168 = vector.shape_cast %167 : vector<8xf32> to vector<8x1xf32>
      %169 = arith.addf %166, %168 : vector<8x1xf32>
      %c3_93 = arith.constant 3 : index
      %c0_94 = arith.constant 0 : index
      %c0_95 = arith.constant 0 : index
      %170 = vector.load %arg8[%c3_93, %c0_94, %c0_95] : memref<4x8x1xf32, #tpu.memory_space<vmem>>, vector<1x8x1xf32>
      %171 = vector.shape_cast %170 : vector<1x8x1xf32> to vector<8x1xf32>
      %172 = vector.shape_cast %169 : vector<8x1xf32> to vector<1x8x1xf32>
      tpu.vector_store %arg8[%c3_93, %c0_94, %c0_95], %172 {strides = array<i32>} : memref<4x8x1xf32, #tpu.memory_space<vmem>>, vector<1x8x1xf32>,
      %c3_96 = arith.constant 3 : index
      %c0_97 = arith.constant 0 : index
      %c0_98 = arith.constant 0 : index
      %173 = vector.load %arg9[%c3_96, %c0_97, %c0_98] : memref<4x8x8xf32, #tpu.memory_space<vmem>>, vector<1x8x8xf32>
      %174 = vector.shape_cast %173 : vector<1x8x8xf32> to vector<8x8xf32>
      %175 = vector.broadcast %160 : vector<8x1xf32> to vector<8x8xf32>
      %176 = arith.mulf %175, %174 : vector<8x8xf32>
      %177 = arith.truncf %163 : vector<8x8xf32> to vector<8x8xbf16>
      %178 = vector.extract_strided_slice %17 {offsets = [0, 24], sizes = [8, 8], strides = [1, 1]} : vector<8x32xbf16> to vector<8x8xbf16>
      %cst_99 = arith.constant dense<0.000000e+00> : vector<8x8xf32>
      %179 = tpu.matmul %177, %178, %cst_99 {dimension_numbers = #tpu.dot_dimension_numbers<[1], [0], [0], [1], [0, 0, 1, 1], [], []>} : vector<8x8xbf16>, vector<8x8xbf16>, vector<8x8xf32> -> vector<8x8xf32>
      %180 = arith.addf %176, %179 : vector<8x8xf32>
      %c3_100 = arith.constant 3 : index
      %c0_101 = arith.constant 0 : index
      %c0_102 = arith.constant 0 : index
      %181 = vector.load %arg9[%c3_100, %c0_101, %c0_102] : memref<4x8x8xf32, #tpu.memory_space<vmem>>, vector<1x8x8xf32>
      %182 = vector.shape_cast %181 : vector<1x8x8xf32> to vector<8x8xf32>
      %183 = vector.shape_cast %180 : vector<8x8xf32> to vector<1x8x8xf32>
      tpu.vector_store %arg9[%c3_100, %c0_101, %c0_102], %183 {strides = array<i32>} : memref<4x8x8xf32, #tpu.memory_space<vmem>>, vector<1x8x8xf32>,
      %c3_103 = arith.constant 3 : index
      %c0_104 = arith.constant 0 : index
      %c0_105 = arith.constant 0 : index
      %184 = vector.load %arg7[%c3_103, %c0_104, %c0_105] : memref<4x8x1xf32, #tpu.memory_space<vmem>>, vector<1x8x1xf32>
      %185 = vector.shape_cast %184 : vector<1x8x1xf32> to vector<8x1xf32>
      %186 = vector.shape_cast %158 : vector<8x1xf32> to vector<1x8x1xf32>
      tpu.vector_store %arg7[%c3_103, %c0_104, %c0_105], %186 {strides = array<i32>} : memref<4x8x1xf32, #tpu.memory_space<vmem>>, vector<1x8x1xf32>,
    } else {
    }
    %c0_i32_3 = arith.constant 0 : i32
    %9 = arith.cmpi eq, %arg2, %c0_i32_3 : i32
    %10 = arith.extui %9 : i1 to i32
    %c0_i32_4 = arith.constant 0 : i32
    %11 = arith.cmpi ne, %10, %c0_i32_4 : i32
    scf.if %11 {
      %c0 = arith.constant 0 : index
      %c0_5 = arith.constant 0 : index
      %c0_6 = arith.constant 0 : index
      %12 = vector.load %arg9[%c0, %c0_5, %c0_6] : memref<4x8x8xf32, #tpu.memory_space<vmem>>, vector<1x8x8xf32>
      %13 = vector.shape_cast %12 : vector<1x8x8xf32> to vector<8x8xf32>
      %c0_7 = arith.constant 0 : index
      %c0_8 = arith.constant 0 : index
      %c0_9 = arith.constant 0 : index
      %14 = vector.load %arg8[%c0_7, %c0_8, %c0_9] : memref<4x8x1xf32, #tpu.memory_space<vmem>>, vector<1x8x1xf32>
      %15 = vector.shape_cast %14 : vector<1x8x1xf32> to vector<8x1xf32>
      %16 = vector.broadcast %15 : vector<8x1xf32> to vector<8x8xf32>
      %17 = arith.divf %13, %16 : vector<8x8xf32>
      %18 = arith.truncf %17 : vector<8x8xf32> to vector<8x8xbf16>
      %c0_10 = arith.constant 0 : index
      %c0_11 = arith.constant 0 : index
      %c0_12 = arith.constant 0 : index
      %19 = vector.load %arg6[%c0_10, %c0_11, %c0_12] : memref<1x8x32xbf16, #tpu.memory_space<vmem>>, vector<1x8x8xbf16>
      %20 = vector.shape_cast %19 : vector<1x8x8xbf16> to vector<8x8xbf16>
      %21 = vector.shape_cast %18 : vector<8x8xbf16> to vector<1x8x8xbf16>
      tpu.vector_store %arg6[%c0_10, %c0_11, %c0_12], %21 {strides = array<i32>} : memref<1x8x32xbf16, #tpu.memory_space<vmem>>, vector<1x8x8xbf16>,
      %c1 = arith.constant 1 : index
      %c0_13 = arith.constant 0 : index
      %c0_14 = arith.constant 0 : index
      %22 = vector.load %arg9[%c1, %c0_13, %c0_14] : memref<4x8x8xf32, #tpu.memory_space<vmem>>, vector<1x8x8xf32>
      %23 = vector.shape_cast %22 : vector<1x8x8xf32> to vector<8x8xf32>
      %c1_15 = arith.constant 1 : index
      %c0_16 = arith.constant 0 : index
      %c0_17 = arith.constant 0 : index
      %24 = vector.load %arg8[%c1_15, %c0_16, %c0_17] : memref<4x8x1xf32, #tpu.memory_space<vmem>>, vector<1x8x1xf32>
      %25 = vector.shape_cast %24 : vector<1x8x1xf32> to vector<8x1xf32>
      %26 = vector.broadcast %25 : vector<8x1xf32> to vector<8x8xf32>
      %27 = arith.divf %23, %26 : vector<8x8xf32>
      %28 = arith.truncf %27 : vector<8x8xf32> to vector<8x8xbf16>
      %c0_18 = arith.constant 0 : index
      %c0_19 = arith.constant 0 : index
      %c8 = arith.constant 8 : index
      %29 = vector.load %arg6[%c0_18, %c0_19, %c8] : memref<1x8x32xbf16, #tpu.memory_space<vmem>>, vector<1x8x8xbf16>
      %30 = vector.shape_cast %29 : vector<1x8x8xbf16> to vector<8x8xbf16>
      %31 = vector.shape_cast %28 : vector<8x8xbf16> to vector<1x8x8xbf16>
      tpu.vector_store %arg6[%c0_18, %c0_19, %c8], %31 {strides = array<i32>} : memref<1x8x32xbf16, #tpu.memory_space<vmem>>, vector<1x8x8xbf16>,
      %c2 = arith.constant 2 : index
      %c0_20 = arith.constant 0 : index
      %c0_21 = arith.constant 0 : index
      %32 = vector.load %arg9[%c2, %c0_20, %c0_21] : memref<4x8x8xf32, #tpu.memory_space<vmem>>, vector<1x8x8xf32>
      %33 = vector.shape_cast %32 : vector<1x8x8xf32> to vector<8x8xf32>
      %c2_22 = arith.constant 2 : index
      %c0_23 = arith.constant 0 : index
      %c0_24 = arith.constant 0 : index
      %34 = vector.load %arg8[%c2_22, %c0_23, %c0_24] : memref<4x8x1xf32, #tpu.memory_space<vmem>>, vector<1x8x1xf32>
      %35 = vector.shape_cast %34 : vector<1x8x1xf32> to vector<8x1xf32>
      %36 = vector.broadcast %35 : vector<8x1xf32> to vector<8x8xf32>
      %37 = arith.divf %33, %36 : vector<8x8xf32>
      %38 = arith.truncf %37 : vector<8x8xf32> to vector<8x8xbf16>
      %c0_25 = arith.constant 0 : index
      %c0_26 = arith.constant 0 : index
      %c16 = arith.constant 16 : index
      %39 = vector.load %arg6[%c0_25, %c0_26, %c16] : memref<1x8x32xbf16, #tpu.memory_space<vmem>>, vector<1x8x8xbf16>
      %40 = vector.shape_cast %39 : vector<1x8x8xbf16> to vector<8x8xbf16>
      %41 = vector.shape_cast %38 : vector<8x8xbf16> to vector<1x8x8xbf16>
      tpu.vector_store %arg6[%c0_25, %c0_26, %c16], %41 {strides = array<i32>} : memref<1x8x32xbf16, #tpu.memory_space<vmem>>, vector<1x8x8xbf16>,
      %c3 = arith.constant 3 : index
      %c0_27 = arith.constant 0 : index
      %c0_28 = arith.constant 0 : index
      %42 = vector.load %arg9[%c3, %c0_27, %c0_28] : memref<4x8x8xf32, #tpu.memory_space<vmem>>, vector<1x8x8xf32>
      %43 = vector.shape_cast %42 : vector<1x8x8xf32> to vector<8x8xf32>
      %c3_29 = arith.constant 3 : index
      %c0_30 = arith.constant 0 : index
      %c0_31 = arith.constant 0 : index
      %44 = vector.load %arg8[%c3_29, %c0_30, %c0_31] : memref<4x8x1xf32, #tpu.memory_space<vmem>>, vector<1x8x1xf32>
      %45 = vector.shape_cast %44 : vector<1x8x1xf32> to vector<8x1xf32>
      %46 = vector.broadcast %45 : vector<8x1xf32> to vector<8x8xf32>
      %47 = arith.divf %43, %46 : vector<8x8xf32>
      %48 = arith.truncf %47 : vector<8x8xf32> to vector<8x8xbf16>
      %c0_32 = arith.constant 0 : index
      %c0_33 = arith.constant 0 : index
      %c24 = arith.constant 24 : index
      %49 = vector.load %arg6[%c0_32, %c0_33, %c24] : memref<1x8x32xbf16, #tpu.memory_space<vmem>>, vector<1x8x8xbf16>
      %50 = vector.shape_cast %49 : vector<1x8x8xbf16> to vector<8x8xbf16>
      %51 = vector.shape_cast %48 : vector<8x8xbf16> to vector<1x8x8xbf16>
      tpu.vector_store %arg6[%c0_32, %c0_33, %c24], %51 {strides = array<i32>} : memref<1x8x32xbf16, #tpu.memory_space<vmem>>, vector<1x8x8xbf16>,
    } else {
    }
    return
  }
  func.func @transform_0(%arg0: i32, %arg1: i32, %arg2: i32) -> (i32, i32, i32) {
    %c0_i32 = arith.constant 0 : i32
    %c0_i32_0 = arith.constant 0 : i32
    return %arg0, %arg1, %c0_i32 : i32, i32, i32
  }
  func.func @transform_1(%arg0: i32, %arg1: i32, %arg2: i32) -> (i32, i32, i32) {
    %0 = arith.minsi %arg2, %arg1 : i32
    %c0_i32 = arith.constant 0 : i32
    %c0_i32_0 = arith.constant 0 : i32
    return %arg0, %0, %c0_i32 : i32, i32, i32
  }
  func.func @transform_2(%arg0: i32, %arg1: i32, %arg2: i32) -> (i32, i32, i32) {
    %0 = arith.minsi %arg2, %arg1 : i32
    %c0_i32 = arith.constant 0 : i32
    %c0_i32_0 = arith.constant 0 : i32
    return %arg0, %0, %c0_i32 : i32, i32, i32
  }
  func.func @transform_3(%arg0: i32, %arg1: i32, %arg2: i32) -> (i32, i32, i32) {
    %c0_i32 = arith.constant 0 : i32
    %c0_i32_0 = arith.constant 0 : i32
    return %arg0, %arg1, %c0_i32 : i32, i32, i32
  }
}

module attributes {stable_mosaic.version = 11 : i64} {
  func.func @final_ln_kernel(%arg0: i32, %arg1: i32, %arg2: memref<1x8x32xf32, #tpu.memory_space<vmem>>, %arg3: memref<1x32xf32, #tpu.memory_space<vmem>>, %arg4: memref<1x32xf32, #tpu.memory_space<vmem>>, %arg5: memref<1x8x32xbf16, #tpu.memory_space<vmem>>) attributes {dimension_semantics = [#tpu.dimension_semantics<parallel>, #tpu.dimension_semantics<parallel>], iteration_bounds = array<i64: 2, 1>, scalar_prefetch = 0 : i64, scratch_operands = 0 : i64, tpu.core_type = #tpu.core_type<tc>, window_params = [{transform_indices = @transform_0, window_bounds = array<i64: 1, 8, 32>}, {pipeline_mode = #tpu.pipeline_mode<synchronous>, transform_indices = @transform_1, window_bounds = array<i64: 1, 32>}, {pipeline_mode = #tpu.pipeline_mode<synchronous>, transform_indices = @transform_2, window_bounds = array<i64: 1, 32>}, {transform_indices = @transform_3, window_bounds = array<i64: 1, 8, 32>}]} {
    %c0 = arith.constant 0 : index
    %c0_0 = arith.constant 0 : index
    %c0_1 = arith.constant 0 : index
    %0 = vector.load %arg2[%c0, %c0_0, %c0_1] : memref<1x8x32xf32, #tpu.memory_space<vmem>>, vector<1x8x32xf32>
    %1 = vector.shape_cast %0 : vector<1x8x32xf32> to vector<8x32xf32>
    %c0_2 = arith.constant 0 : index
    %c0_3 = arith.constant 0 : index
    %2 = vector.load %arg3[%c0_2, %c0_3] : memref<1x32xf32, #tpu.memory_space<vmem>>, vector<1x32xf32>
    %3 = vector.shape_cast %2 : vector<1x32xf32> to vector<32xf32>
    %c0_4 = arith.constant 0 : index
    %c0_5 = arith.constant 0 : index
    %4 = vector.load %arg4[%c0_4, %c0_5] : memref<1x32xf32, #tpu.memory_space<vmem>>, vector<1x32xf32>
    %5 = vector.shape_cast %4 : vector<1x32xf32> to vector<32xf32>
    %cst = arith.constant dense<0.000000e+00> : vector<8xf32>
    %6 = vector.multi_reduction <add>, %1, %cst [1] : vector<8x32xf32> to vector<8xf32>
    %7 = vector.shape_cast %6 : vector<8xf32> to vector<8x1xf32>
    %cst_6 = arith.constant 3.200000e+01 : f32
    %8 = vector.broadcast %cst_6 : f32 to vector<8x1xf32>
    %9 = arith.divf %7, %8 : vector<8x1xf32>
    %10 = vector.broadcast %9 : vector<8x1xf32> to vector<8x32xf32>
    %11 = arith.subf %1, %10 : vector<8x32xf32>
    %12 = arith.mulf %11, %11 : vector<8x32xf32>
    %cst_7 = arith.constant dense<0.000000e+00> : vector<8xf32>
    %13 = vector.multi_reduction <add>, %12, %cst_7 [1] : vector<8x32xf32> to vector<8xf32>
    %14 = vector.shape_cast %13 : vector<8xf32> to vector<8x1xf32>
    %cst_8 = arith.constant 3.200000e+01 : f32
    %15 = vector.broadcast %cst_8 : f32 to vector<8x1xf32>
    %16 = arith.divf %14, %15 : vector<8x1xf32>
    %17 = vector.broadcast %9 : vector<8x1xf32> to vector<8x32xf32>
    %18 = arith.subf %1, %17 : vector<8x32xf32>
    %cst_9 = arith.constant 9.99999974E-6 : f32
    %19 = vector.broadcast %cst_9 : f32 to vector<8x1xf32>
    %20 = arith.addf %16, %19 : vector<8x1xf32>
    %21 = math.rsqrt %20 : vector<8x1xf32>
    %22 = vector.broadcast %21 : vector<8x1xf32> to vector<8x32xf32>
    %23 = arith.mulf %18, %22 : vector<8x32xf32>
    %24 = vector.shape_cast %3 : vector<32xf32> to vector<1x32xf32>
    %25 = vector.broadcast %24 : vector<1x32xf32> to vector<8x32xf32>
    %26 = arith.mulf %23, %25 : vector<8x32xf32>
    %27 = vector.shape_cast %5 : vector<32xf32> to vector<1x32xf32>
    %28 = vector.broadcast %27 : vector<1x32xf32> to vector<8x32xf32>
    %29 = arith.addf %26, %28 : vector<8x32xf32>
    %30 = arith.truncf %29 : vector<8x32xf32> to vector<8x32xbf16>
    %c0_10 = arith.constant 0 : index
    %c0_11 = arith.constant 0 : index
    %c0_12 = arith.constant 0 : index
    %31 = vector.load %arg5[%c0_10, %c0_11, %c0_12] : memref<1x8x32xbf16, #tpu.memory_space<vmem>>, vector<1x8x32xbf16>
    %32 = vector.shape_cast %31 : vector<1x8x32xbf16> to vector<8x32xbf16>
    %33 = vector.shape_cast %30 : vector<8x32xbf16> to vector<1x8x32xbf16>
    tpu.vector_store %arg5[%c0_10, %c0_11, %c0_12], %33 {strides = array<i32>} : memref<1x8x32xbf16, #tpu.memory_space<vmem>>, vector<1x8x32xbf16>,
    return
  }
  func.func @transform_0(%arg0: i32, %arg1: i32) -> (i32, i32, i32) {
    %c0_i32 = arith.constant 0 : i32
    %c0_i32_0 = arith.constant 0 : i32
    return %arg0, %arg1, %c0_i32 : i32, i32, i32
  }
  func.func @transform_1(%arg0: i32, %arg1: i32) -> (i32, i32) {
    %c0_i32 = arith.constant 0 : i32
    %c0_i32_0 = arith.constant 0 : i32
    %c0_i32_1 = arith.constant 0 : i32
    return %c0_i32, %c0_i32_0 : i32, i32
  }
  func.func @transform_2(%arg0: i32, %arg1: i32) -> (i32, i32) {
    %c0_i32 = arith.constant 0 : i32
    %c0_i32_0 = arith.constant 0 : i32
    %c0_i32_1 = arith.constant 0 : i32
    return %c0_i32, %c0_i32_0 : i32, i32
  }
  func.func @transform_3(%arg0: i32, %arg1: i32) -> (i32, i32, i32) {
    %c0_i32 = arith.constant 0 : i32
    %c0_i32_0 = arith.constant 0 : i32
    return %arg0, %arg1, %c0_i32 : i32, i32, i32
  }
}

module attributes {stable_mosaic.version = 11 : i64} {
  func.func @lm_head_kernel(%arg0: i32, %arg1: i32, %arg2: memref<16x32xbf16, #tpu.memory_space<vmem>>, %arg3: memref<32x512xbf16, #tpu.memory_space<vmem>>, %arg4: memref<1x512xf32, #tpu.memory_space<vmem>>, %arg5: memref<16x512xf32, #tpu.memory_space<vmem>>) attributes {dimension_semantics = [#tpu.dimension_semantics<parallel>, #tpu.dimension_semantics<parallel>], iteration_bounds = array<i64: 1, 1>, scalar_prefetch = 0 : i64, scratch_operands = 0 : i64, tpu.core_type = #tpu.core_type<tc>, window_params = [{transform_indices = @transform_0, window_bounds = array<i64: 16, 32>}, {transform_indices = @transform_1, window_bounds = array<i64: 32, 512>}, {transform_indices = @transform_2, window_bounds = array<i64: 1, 512>}, {transform_indices = @transform_3, window_bounds = array<i64: 16, 512>}]} {
    %c0 = arith.constant 0 : index
    %c0_0 = arith.constant 0 : index
    %0 = vector.load %arg2[%c0, %c0_0] : memref<16x32xbf16, #tpu.memory_space<vmem>>, vector<16x32xbf16>
    %c0_1 = arith.constant 0 : index
    %c0_2 = arith.constant 0 : index
    %1 = vector.load %arg3[%c0_1, %c0_2] : memref<32x512xbf16, #tpu.memory_space<vmem>>, vector<32x512xbf16>
    %cst = arith.constant dense<0.000000e+00> : vector<16x512xf32>
    %2 = tpu.matmul %0, %1, %cst {dimension_numbers = #tpu.dot_dimension_numbers<[1], [0], [0], [1], [0, 0, 1, 1], [], []>} : vector<16x32xbf16>, vector<32x512xbf16>, vector<16x512xf32> -> vector<16x512xf32>
    %c0_3 = arith.constant 0 : index
    %c0_4 = arith.constant 0 : index
    %3 = vector.load %arg4[%c0_3, %c0_4] : memref<1x512xf32, #tpu.memory_space<vmem>>, vector<1x512xf32>
    %4 = vector.shape_cast %3 : vector<1x512xf32> to vector<512xf32>
    %5 = vector.shape_cast %4 : vector<512xf32> to vector<1x512xf32>
    %6 = vector.broadcast %5 : vector<1x512xf32> to vector<16x512xf32>
    %7 = arith.addf %2, %6 : vector<16x512xf32>
    %c0_5 = arith.constant 0 : index
    %c0_6 = arith.constant 0 : index
    %8 = vector.load %arg5[%c0_5, %c0_6] : memref<16x512xf32, #tpu.memory_space<vmem>>, vector<16x512xf32>
    tpu.vector_store %arg5[%c0_5, %c0_6], %7 {strides = array<i32>} : memref<16x512xf32, #tpu.memory_space<vmem>>, vector<16x512xf32>,
    return
  }
  func.func @transform_0(%arg0: i32, %arg1: i32) -> (i32, i32) {
    %c0_i32 = arith.constant 0 : i32
    %c0_i32_0 = arith.constant 0 : i32
    return %arg1, %c0_i32 : i32, i32
  }
  func.func @transform_1(%arg0: i32, %arg1: i32) -> (i32, i32) {
    %c0_i32 = arith.constant 0 : i32
    %c0_i32_0 = arith.constant 0 : i32
    return %c0_i32, %arg0 : i32, i32
  }
  func.func @transform_2(%arg0: i32, %arg1: i32) -> (i32, i32) {
    %c0_i32 = arith.constant 0 : i32
    %c0_i32_0 = arith.constant 0 : i32
    return %c0_i32, %arg0 : i32, i32
  }
  func.func @transform_3(%arg0: i32, %arg1: i32) -> (i32, i32) {
    %c0_i32 = arith.constant 0 : i32
    return %arg1, %arg0 : i32, i32
  }
}

</mosaic_0001>

<bundles_post_ra>
// kernel: gpt_forward.14
= control target key start
LH: loop header
LB: loop body
LE: loop exit
PB: predicated region body
PF: predicated region fallthrough
CT: control target
= control target key end

     0   :  { %s387_s12 = smov 0   ;;  %s389_s13 = smov 0   ;;  %s426_s0 = inlined_call_operand.vmem [shape: f32[2,8,32], index: 0, kind: input, shape index: {}]   ;;  %s427_s1 = inlined_call_operand.vmem [shape: f32[1,32], index: 1, kind: input, shape index: {}]   ;;  %s428_s2 = inlined_call_operand.vmem [shape: f32[1,32], index: 2, kind: input, shape index: {}]   ;;  %s429_s3 = inlined_call_operand.vmem [shape: bf16[2,8,32], index: 3, kind: output, shape index: {}]  }
   0x1   :  { %s391_s14 = smov 0  }
   0x2 LB: > { %s25_s15 = sadd.s32 1, %s361_s13  ;;  %p310_p0 = scmp.ge.s32.totalorder %s365_s14, 1  ;;  %s365_s14 = sphi %s391_s14, %s13_s14   ;;  %s361_s13 = sphi %s389_s13, %s431_s13   ;;  %s357_s12 = sphi %s387_s12, %s430_s12  }
   0x3   : > { %p27_p1 = scmp.ge.s32.totalorder %s25_s15, 2  ;;  %p155_p2 = scmp.lt.s32.totalorder %s365_s14, 3 }
   0x5   : > { %s433_s15 = smov (%p27_p1, %s25_s15), 0  ;;  %p156_p3 = pnand %p310_p0, %p155_p2 }
   0x6   : > { %p183_p4 = scmp.lt.s32.totalorder (!%p156_p3), %s357_s12, 1  ;;  %vm200_vm0 = vcmask (!%p156_p3), 261120   ;;  %v313_v11 = vld [vmem:[%s427_s1] ss:$0 sm:$0xff] (!%p156_p3)  ;;  %vm230_vm1 = vcmask (!%p156_p3), 257024  }
   0x7   : > { %159 = sbr.rel (%p156_p3) target bundleno = 334 (0x14e), region = 32  ;;  %v314_v13 = vld [vmem:[%s428_s2] ss:$0 sm:$0xff] (!%p156_p3) }
   0xe   : > { %s435_s12 = smov (!%p183_p4, %s357_s12), 1 }
   0xf   : > { %s311_s16 = sshll.u32 %s435_s12, 3  ;;  %s312_s24 = sshll.u32 %s435_s12, 2 }
  0x10   : > { %s189_s19 = scalar_lea.vmem %s426_s0, %s311_s16  ;;  %s196_s27 = scalar_lea.vmem %s429_s3, %s312_s24 }
  0x11   : > { %v197_v0 = vld [vmem:[%s189_s19] sm:$0xff] }
  0x12   : > { %v201_v1 = vsel %vm200_vm0, %v197_v0, 0.0 }
  0x13   : > { %202 = vadd.xlane.f32.xlu0 %v201_v1 }
  0xa0   : > { %v203_v2 = vpop.xlane.xlu0 %202 }
  0xa1   : > { %v205_v3 = vmul.f32 0.03125, %v203_v2 }
  0xa3   : > { %v206_v4 = vsub.f32 %v197_v0, %v205_v3 }
  0xa5   : > { %v207_v5 = vmul.f32 %v206_v4, %v206_v4 }
  0xa7   : > { %v208_v6 = vsel %vm200_vm0, %v207_v5, 0.0 }
  0xa8   : > { %209 = vadd.xlane.f32.xlu0 %v208_v6 }
 0x135   : > { %v210_v7 = vpop.xlane.xlu0 %209 }
 0x136   : > { %v211_v8 = vmul.f32 0.03125, %v210_v7 }
 0x138   : > { %v212_v9 = vadd.f32 1e-05, %v211_v8 }
 0x13a   : > { %341 = vrsqrt.f32 %v212_v9 }
 0x144   : > { %v342_v10 = vpop.eup %341 }
 0x145   : > { %v214_v12 = vmul.f32 %v342_v10, %v206_v4 }
 0x147   : > { %v221_v14 = vmul.f32 %v313_v11, %v214_v12 }
 0x149   : > { %v228_v15 = vadd.f32 %v314_v13, %v221_v14 }
 0x14b   : > { %v229_v16 = vpack.c.bf16 %v228_v15, %v228_v15 }
 0x14d   : > { %231 = vst.msk [vmem:[%s196_s27] sm:$0xf] %vm230_vm1, %v229_v16 }
 0x14e PF: > { %s13_s14 = sadd.s32 1, %s365_s14   ;;  %s430_s12 = smov %s361_s13 }
 0x14f   : > { %p10_p5 = scmp.ge.s32.totalorder %s13_s14, 4   ;;  %s431_s13 = smov %s433_s15 }
 0x151   :  { %12 = sbr.rel (!%p10_p5) target bundleno = 2 (0x2), region = 62 }

// kernel: gpt_forward.8
= control target key start
LH: loop header
LB: loop body
LE: loop exit
PB: predicated region body
PF: predicated region fallthrough
CT: control target
= control target key end

     0   :  { %s742_s24 = smov 0   ;;  %s744_s25 = smov 0   ;;  %s803_s0 = inlined_call_operand.vmem [shape: f32[2,8,32], index: 0, kind: input, shape index: {}]   ;;  %s804_s1 = inlined_call_operand.vmem [shape: f32[1,32], index: 1, kind: input, shape index: {}]   ;;  %s805_s2 = inlined_call_operand.vmem [shape: f32[1,32], index: 2, kind: input, shape index: {}]   ;;  %s806_s3 = inlined_call_operand.vmem [shape: bf16[32,96], index: 3, kind: input, shape index: {}]   ;;  %s807_s4 = inlined_call_operand.vmem [shape: f32[1,96], index: 4, kind: input, shape index: {}]   ;;  %s808_s5 = inlined_call_operand.vmem [shape: bf16[2,8,32], index: 5, kind: output, shape index: {0}]   ;;  %s809_s6 = inlined_call_operand.vmem [shape: bf16[2,8,32], index: 6, kind: output, shape index: {1}]   ;;  %s810_s7 = inlined_call_operand.vmem [shape: bf16[2,8,32], index: 7, kind: output, shape index: {2}]  }
   0x1   :  { %s746_s26 = smov 0  }
   0x2 LB: > { %s30_s27 = sadd.s32 1, %s692_s25  ;;  %p616_p0 = scmp.ge.s32.totalorder %s696_s26, 1  ;;  %s696_s26 = sphi %s746_s26, %s18_s26   ;;  %s692_s25 = sphi %s744_s25, %s812_s25   ;;  %s688_s24 = sphi %s742_s24, %s811_s24  }
   0x3   : > { %p32_p1 = scmp.ge.s32.totalorder %s30_s27, 2  ;;  %p264_p2 = scmp.lt.s32.totalorder %s696_s26, 3 }
   0x5   : > { %s814_s27 = smov (%p32_p1, %s30_s27), 0  ;;  %p265_p3 = pnand %p616_p0, %p264_p2 }
   0x6   : > { %p314_p4 = scmp.lt.s32.totalorder (!%p265_p3), %s688_s24, 1  ;;  %vm346_vm0 = vcmask (!%p265_p3), 261120   ;;  %v670_v7 = vld [vmem:[%s806_s3] sm:$0xff] (!%p265_p3)   ;;  %v698_v8 = vmov (!%p265_p3), 0.0   ;;  %v671_v9 = vld [vmem:[%s806_s3 + $0x8] sm:$0xff] (!%p265_p3)   ;;  %vm699_vm1 = vmmov (!%p265_p3), 0  }
   0x7   : > { %268 = sbr.rel (%p265_p3) target bundleno = 669 (0x29d), region = 40  ;;  %634 = vmatprep.subr.bf16.mxu0 (!%p265_p3), %v698_v8  ;;  %638 = vmatprep.mubr.msk.bf16.mxu0 (!%p265_p3), %vm699_vm1, %v698_v8  ;;  %v621_v14 = vld [vmem:[%s804_s1] ss:$0 sm:$0xff] (!%p265_p3)  ;;  %vm443_vm2 = vcmask (!%p265_p3), 257024   ;;  %s700_s23 = smov (!%p265_p3), 96  }
   0x8   : > { %635 = vmatpush3.bf16.msra.mxu0 (!%p265_p3), %v670_v7  ;;  %v622_v16 = vld [vmem:[%s805_s2] ss:$0 sm:$0xff] (!%p265_p3) }
   0x9   : > { %636 = vmatprep.subr.bf16.mxu0 (!%p265_p3), %v698_v8  ;;  %v623_v20 = vld [vmem:[%s807_s4] ss:$0 sm:$0xff] (!%p265_p3) }
   0xc   : > { %637 = vmatpush3.bf16.msra.mxu0 (!%p265_p3), %v671_v9 }
   0xe   : > { %s816_s24 = smov (!%p314_p4, %s688_s24), 1 }
   0xf   : > { %s617_s28 = sshll.u32 %s816_s24, 3  ;;  %s618_s19 = sshll.u32 %s816_s24, 2 }
  0x10   : > { %s320_s8 = scalar_lea.vmem %s803_s0, %s617_s28  ;;  %s327_s22 = scalar_lea.vmem %s808_s5, %s618_s19 }
  0x11   : > { %v343_v0 = vld [vmem:[%s320_s8] sm:$0xff]  ;;  %s701_s28 = smov 64   ;;  %s334_s24 = scalar_lea.vmem %s809_s6, %s618_s19 }
  0x12   : > { %v347_v1 = vsel %vm346_vm0, %v343_v0, 0.0  ;;  %s341_s10 = scalar_lea.vmem %s810_s7, %s618_s19 }
  0x13   : > { %348 = vadd.xlane.f32.xlu0 %v347_v1 }
  0xa0   : > { %v349_v2 = vpop.xlane.xlu0 %348 }
  0xa1   : > { %v351_v3 = vmul.f32 0.03125, %v349_v2 }
  0xa3   : > { %v352_v4 = vsub.f32 %v343_v0, %v351_v3 }
  0xa5   : > { %v353_v5 = vmul.f32 %v352_v4, %v352_v4 }
  0xa7   : > { %v354_v6 = vsel %vm346_vm0, %v353_v5, 0.0 }
  0xa8   : > { %355 = vadd.xlane.f32.xlu0 %v354_v6 }
 0x135   : > { %v356_v10 = vpop.xlane.xlu0 %355 }
 0x136   : > { %v357_v11 = vmul.f32 0.03125, %v356_v10 }
 0x138   : > { %v358_v12 = vadd.f32 1e-05, %v357_v11 }
 0x13a   : > { %672 = vrsqrt.f32 %v358_v12 }
 0x144   : > { %v673_v13 = vpop.eup %672 }
 0x145   : > { %v360_v15 = vmul.f32 %v673_v13, %v352_v4 }
 0x147   : > { %v367_v17 = vmul.f32 %v621_v14, %v360_v15 }
 0x149   : > { %v374_v18 = vadd.f32 %v622_v16, %v367_v17 }
 0x14b   : > { %v375_v19 = vpack.c.bf16 %v374_v18, %v374_v18 }
 0x14d   : > { %639 = vmatmul.mubr.msk.bf16.vlgmr.msra.gmra.mrb[0].mxu0 %vm346_vm0, %v375_v19 }
 0x220   : > { %v436_v21 = vpop.f32.mrb[0].mxu0 }
 0x221   : > { %v437_v22 = vadd.f32 %v623_v20, %v436_v21  ;;  %v640_v23 = vpop.f32.mrb[1].mxu0 }
 0x222   : > { %v439_v24 = vpop.f32.mrb[2].mxu0 }
 0x223   : > { %v442_v25 = vpack.c.bf16 %v437_v22, %v437_v22  ;;  %v641_v26 = vpop.f32.mrb[3].mxu0 }
 0x225   : > { %448 = vrot.lane.b32.xlu1 %v442_v25, %s700_s23  ;;  %444 = vst.msk [vmem:[%s327_s22] sm:$0xf] %vm443_vm2, %v442_v25 }
 0x229   : > { %452 = vrot.lane.b32.xlu1 %v442_v25, %s701_s28 }
 0x297   : > { %v449_v27 = vpop.permute.xlu1 %448 }
 0x298   : > { %451 = vst.msk [vmem:[%s334_s24] sm:$0xf] %vm443_vm2, %v449_v27 }
 0x29b   : > { %v453_v28 = vpop.permute.xlu1 %452 }
 0x29c   : > { %455 = vst.msk [vmem:[%s341_s10] sm:$0xf] %vm443_vm2, %v453_v28 }
 0x29d PF: > { %s18_s26 = sadd.s32 1, %s696_s26   ;;  %s811_s24 = smov %s692_s25 }
 0x29e   : > { %p15_p5 = scmp.ge.s32.totalorder %s18_s26, 4   ;;  %s812_s25 = smov %s814_s27 }
 0x2a0   :  { %17 = sbr.rel (!%p15_p5) target bundleno = 2 (0x2), region = 94 }

// kernel: gpt_forward.10
= control target key start
LH: loop header
LB: loop body
LE: loop exit
PB: predicated region body
PF: predicated region fallthrough
CT: control target
= control target key end

     0   :  { %s997_s13 = smov 0   ;;  %s999_s14 = smov 0   ;;  %s1117_s0 = inlined_call_operand.vmem [shape: f32[2,8,32], index: 0, kind: input, shape index: {}]   ;;  %s1118_s1 = inlined_call_operand.vmem [shape: bf16[2,8,32], index: 1, kind: input, shape index: {}]   ;;  %s1119_s2 = inlined_call_operand.vmem [shape: bf16[32,32], index: 2, kind: input, shape index: {}]   ;;  %s1120_s3 = inlined_call_operand.vmem [shape: f32[1,32], index: 3, kind: input, shape index: {}]   ;;  %s1121_s4 = inlined_call_operand.vmem [shape: f32[1,32], index: 4, kind: input, shape index: {}]   ;;  %s1122_s5 = inlined_call_operand.vmem [shape: f32[1,32], index: 5, kind: input, shape index: {}]   ;;  %s1123_s6 = inlined_call_operand.vmem [shape: bf16[32,128], index: 6, kind: input, shape index: {}]   ;;  %s1124_s7 = inlined_call_operand.vmem [shape: f32[1,128], index: 7, kind: input, shape index: {}]   ;;  %s1125_s8 = inlined_call_operand.vmem [shape: bf16[128,32], index: 8, kind: input, shape index: {}]   ;;  %s1126_s9 = inlined_call_operand.vmem [shape: f32[1,32], index: 9, kind: input, shape index: {}]   ;;  %s1127_s10 = inlined_call_operand.vmem [shape: f32[2,8,32], index: 10, kind: output, shape index: {}]  }
   0x1   :  { %s1001_s15 = smov 0  }
   0x2 LB: > { %s32_s16 = sadd.s32 1, %s934_s14  ;;  %p798_p0 = scmp.ge.s32.totalorder %s938_s15, 1  ;;  %s938_s15 = sphi %s1001_s15, %s20_s15   ;;  %s934_s14 = sphi %s999_s14, %s1129_s14   ;;  %s930_s13 = sphi %s997_s13, %s1128_s13  }
   0x3   : > { %p34_p1 = scmp.ge.s32.totalorder %s32_s16, 2  ;;  %p344_p2 = scmp.lt.s32.totalorder %s938_s15, 3 }
   0x5   : > { %s1131_s16 = smov (%p34_p1, %s32_s16), 0  ;;  %p345_p3 = pnand %p798_p0, %p344_p2 }
   0x6   : > { %v900_v0 = vld [vmem:[%s1119_s2] sm:$0xff] (!%p345_p3)   ;;  %v940_v1 = vmov (!%p345_p3), 0.0   ;;  %v901_v2 = vld [vmem:[%s1119_s2 + $0x8] sm:$0xff] (!%p345_p3)   ;;  %vm941_vm0 = vmmov (!%p345_p3), 0   ;;  %p393_p4 = scmp.lt.s32.totalorder (!%p345_p3), %s930_s13, 1  ;;  %vm440_vm1 = vcmask (!%p345_p3), 261120  }
   0x7   : > { %348 = sbr.rel (%p345_p3) target bundleno = 1009 (0x3f1), region = 60  ;;  %838 = vmatprep.subr.bf16.mxu1 (!%p345_p3), %v940_v1  ;;  %854 = vmatprep.subr.bf16.mxu0 (!%p345_p3), %v940_v1  ;;  %v802_v4 = vld [vmem:[%s1120_s3] ss:$0 sm:$0xff] (!%p345_p3)  ;;  %v903_v19 = vld [vmem:[%s1123_s6 + $0x8] sm:$0xff] (!%p345_p3)   ;;  %v906_v32 = vld [vmem:[%s1125_s8 + $0x10] sm:$0xff] (!%p345_p3)  }
   0x8   : > { %839 = vmatpush3.bf16.msra.mxu1 (!%p345_p3), %v900_v0  ;;  %842 = vmatprep.mubr.msk.bf16.mxu1 (!%p345_p3), %vm941_vm0, %v940_v1  ;;  %v902_v18 = vld [vmem:[%s1123_s6] sm:$0xff] (!%p345_p3)   ;;  %v905_v31 = vld [vmem:[%s1125_s8 + $0x8] sm:$0xff] (!%p345_p3)   ;;  %v907_v33 = vld [vmem:[%s1125_s8 + $0x18] sm:$0xff] (!%p345_p3)  }
   0x9   : > { %840 = vmatprep.subr.bf16.mxu1 (!%p345_p3), %v940_v1  ;;  %870 = vmatprep.mubr.msk.bf16.mxu0 (!%p345_p3), %vm941_vm0, %v940_v1  ;;  %v806_v24 = vld [vmem:[%s1121_s4] ss:$0 sm:$0xff] (!%p345_p3)  ;;  %v909_v35 = vld [vmem:[%s1125_s8 + $0x28] sm:$0xff] (!%p345_p3)   ;;  %v910_v36 = vld [vmem:[%s1125_s8 + $0x30] sm:$0xff] (!%p345_p3)  }
   0xa   : > { %v807_v26 = vld [vmem:[%s1122_s5] ss:$0 sm:$0xff] (!%p345_p3)  ;;  %v911_v37 = vld [vmem:[%s1125_s8 + $0x38] sm:$0xff] (!%p345_p3)  }
   0xb   : > { %v904_v30 = vld [vmem:[%s1125_s8] sm:$0xff] (!%p345_p3)  }
   0xc   : > { %841 = vmatpush3.bf16.msra.mxu1 (!%p345_p3), %v901_v2  ;;  %855 = vmatpush3.bf16.msra.mxu0 (!%p345_p3), %v904_v30  ;;  %v908_v34 = vld [vmem:[%s1125_s8 + $0x20] sm:$0xff] (!%p345_p3)  }
   0xd   : > { %846 = vmatprep.subr.bf16.mxu1 (!%p345_p3), %v940_v1  ;;  %856 = vmatprep.subr.bf16.mxu0 (!%p345_p3), %v940_v1  ;;  %v808_v38 = vld [vmem:[%s1124_s7] ss:$0 sm:$0xff] (!%p345_p3) }
   0xe   : > { %s1133_s13 = smov (!%p393_p4, %s930_s13), 1  ;;  %v812_v54 = vld [vmem:[%s1126_s9] ss:$0 sm:$0xff] }
   0xf   : > { %s800_s21 = sshll.u32 %s1133_s13, 2  ;;  %s799_s25 = sshll.u32 %s1133_s13, 3 }
  0x10   : > { %s406_s24 = scalar_lea.vmem %s1118_s1, %s800_s21  ;;  %s399_s28 = scalar_lea.vmem %s1117_s0, %s799_s25  ;;  %857 = vmatpush3.bf16.msra.mxu0 %v905_v31 }
  0x11   : > { %v416_v3 = vld [vmem:[%s406_s24] sm:$0xf]  ;;  %858 = vmatprep.subr.bf16.mxu0 %v940_v1  ;;  %s413_s11 = scalar_lea.vmem %s1127_s10, %s799_s25 }
  0x12   : > { %843 = vmatmul.mubr.msk.bf16.vlgmr.msra.gmra.mrb[0].mxu1 %vm440_vm1, %v416_v3  ;;  %v415_v5 = vld [vmem:[%s399_s28] sm:$0xff] }
  0x13   : > { %850 = vmatprep.mubr.msk.bf16.mxu1 %vm941_vm0, %v940_v1  ;;  %847 = vmatpush3.bf16.msra.mxu1 %v902_v18 }
  0x14   : > { %848 = vmatprep.subr.bf16.mxu1 %v940_v1  ;;  %859 = vmatpush3.bf16.msra.mxu0 %v906_v32 }
  0x15   : > { %860 = vmatprep.subr.bf16.mxu0 %v940_v1 }
  0x17   : > { %849 = vmatpush3.bf16.msra.mxu1 %v903_v19 }
  0x18   : > { %861 = vmatpush3.bf16.msra.mxu0 %v907_v33 }
  0x19   : > { %862 = vmatprep.subr.bf16.mxu0 %v940_v1 }
  0x1c   : > { %863 = vmatpush3.bf16.msra.mxu0 %v908_v34 }
  0x1d   : > { %864 = vmatprep.subr.bf16.mxu0 %v940_v1 }
  0x20   : > { %865 = vmatpush3.bf16.msra.mxu0 %v909_v35 }
  0x21   : > { %866 = vmatprep.subr.bf16.mxu0 %v940_v1 }
  0x24   : > { %867 = vmatpush3.bf16.msra.mxu0 %v910_v36 }
  0x25   : > { %868 = vmatprep.subr.bf16.mxu0 %v940_v1 }
  0x28   : > { %869 = vmatpush3.bf16.msra.mxu0 %v911_v37 }
  0xe5   : > { %v478_v6 = vpop.f32.mrb[0].mxu1 }
  0xe6   : > { %v479_v7 = vadd.f32 %v802_v4, %v478_v6  ;;  %v844_v8 = vpop.f32.mrb[1].mxu1 }
  0xe7   : > { %v481_v9 = vpop.f32.mrb[2].mxu1 }
  0xe8   : > { %v1044_v10 = vadd.f32 %v479_v7, %v415_v5  ;;  %v845_v11 = vpop.f32.mrb[3].mxu1 }
  0xea   : > { %v487_v12 = vsel %vm440_vm1, %v1044_v10, 0.0 }
  0xeb   : > { %488 = vadd.xlane.f32.xlu0 %v487_v12 }
 0x178   : > { %v489_v13 = vpop.xlane.xlu0 %488 }
 0x179   : > { %v491_v14 = vmul.f32 0.03125, %v489_v13 }
 0x17b   : > { %v492_v15 = vsub.f32 %v1044_v10, %v491_v14 }
 0x17d   : > { %v493_v16 = vmul.f32 %v492_v15, %v492_v15 }
 0x17f   : > { %v494_v17 = vsel %vm440_vm1, %v493_v16, 0.0 }
 0x180   : > { %495 = vadd.xlane.f32.xlu0 %v494_v17 }
 0x20d   : > { %v496_v20 = vpop.xlane.xlu0 %495 }
 0x20e   : > { %v497_v21 = vmul.f32 0.03125, %v496_v20 }
 0x210   : > { %v498_v22 = vadd.f32 1e-05, %v497_v21 }
 0x212   : > { %912 = vrsqrt.f32 %v498_v22 }
 0x21c   : > { %v913_v23 = vpop.eup %912 }
 0x21d   : > { %v500_v25 = vmul.f32 %v913_v23, %v492_v15 }
 0x21f   : > { %v507_v27 = vmul.f32 %v806_v24, %v500_v25 }
 0x221   : > { %v514_v28 = vadd.f32 %v807_v26, %v507_v27 }
 0x223   : > { %v515_v29 = vpack.c.bf16 %v514_v28, %v514_v28 }
 0x225   : > { %851 = vmatmul.mubr.msk.bf16.vlgmr.msra.gmra.mrb[4].mxu1 %vm440_vm1, %v515_v29 }
 0x2f8   : > { %v576_v39 = vpop.f32.mrb[4].mxu1 }
 0x2f9   : > { %v577_v40 = vadd.f32 %v808_v38, %v576_v39  ;;  %v852_v41 = vpop.f32.mrb[5].mxu1 }
 0x2fa   : > { %v579_v42 = vpop.f32.mrb[6].mxu1 }
 0x2fb   : > { %v582_v43 = vmul.f32 %v577_v40, %v577_v40  ;;  %v853_v44 = vpop.f32.mrb[7].mxu1 }
 0x2fd   : > { %v583_v45 = vmul.f32 %v582_v43, %v577_v40 }
 0x2ff   : > { %v584_v46 = vmul.f32 0.044715, %v583_v45 }
 0x301   : > { %v585_v47 = vadd.f32 %v584_v46, %v577_v40 }
 0x303   : > { %v586_v48 = vmul.f32 0.7978846, %v585_v47 }
 0x305   : > { %914 = vtanh.f32 %v586_v48 }
 0x30f   : > { %v915_v49 = vpop.eup %914 }
 0x310   : > { %v588_v50 = vadd.f32 1.0, %v915_v49 }
 0x312   : > { %v589_v51 = vmul.f32 0.5, %v588_v50 }
 0x314   : > { %v590_v52 = vmul.f32 %v589_v51, %v577_v40 }
 0x316   : > { %v591_v53 = vpack.c.bf16 %v590_v52, %v590_v52 }
 0x318   : > { %871 = vmatmul.mubr.bf16.vlgmr.msra.gmra.mrb[0].mxu0 %v591_v53 }
 0x3eb   : > { %v697_v55 = vpop.f32.mrb[0].mxu0 }
 0x3ec   : > { %v698_v56 = vadd.f32 %v812_v54, %v697_v55  ;;  %v872_v57 = vpop.f32.mrb[1].mxu0 }
 0x3ed   : > { %v700_v58 = vpop.f32.mrb[2].mxu0 }
 0x3ee   : > { %v703_v59 = vadd.f32 %v698_v56, %v1044_v10  ;;  %v873_v60 = vpop.f32.mrb[3].mxu0 }
 0x3f0   : > { %704 = vst.msk [vmem:[%s413_s11] sm:$0xff] %vm440_vm1, %v703_v59 }
 0x3f1 PF: > { %s20_s15 = sadd.s32 1, %s938_s15   ;;  %s1128_s13 = smov %s934_s14 }
 0x3f2   : > { %p17_p5 = scmp.ge.s32.totalorder %s20_s15, 4   ;;  %s1129_s14 = smov %s1131_s16 }
 0x3f4   :  { %19 = sbr.rel (!%p17_p5) target bundleno = 2 (0x2), region = 93 }

// kernel: gpt_forward.15
= control target key start
LH: loop header
LB: loop body
LE: loop exit
PB: predicated region body
PF: predicated region fallthrough
CT: control target
= control target key end

     0   :  { %v219_v1 = vmov 0   ;;  %vm92_vm0 = vcmask 261120   ;;  %v27_v10 = vlaneseq  ;;  %s294_s1 = inlined_call_operand.vmem [shape: bf16[32,512], index: 1, kind: input, shape index: {}]   ;;  %s295_s0 = inlined_call_operand.vmem [shape: bf16[16,32], index: 0, kind: input, shape index: {}]   ;;  %s296_s2 = inlined_call_operand.vmem [shape: f32[1,512], index: 2, kind: input, shape index: {}]   ;;  %s297_s3 = inlined_call_operand.vmem [shape: f32[16,512], index: 3, kind: output, shape index: {}]  }
   0x1   :  { %v206_v0 = vld [vmem:[%s294_s1 + $0x4] ss:$16 sps:$4 sm:$0xff]   ;;  %128 = vmatprep.mubr.bf16.mxu0 %v219_v1  ;;  %171 = vmatprep.mubr.bf16.mxu1 %v219_v1  ;;  %v208_v2 = vld [vmem:[%s294_s1 + $0xc] ss:$16 sps:$4 sm:$0xff]   ;;  %v210_v3 = vld [vmem:[%s294_s1] ss:$16 sps:$4 sm:$0xff]  }
   0x2   :  { %96 = vmatprep.subr.bf16.mxu0 %v206_v0  ;;  %v211_v4 = vld [vmem:[%s294_s1 + $0x8] ss:$16 sps:$4 sm:$0xff]   ;;  %139 = vmatprep.subr.bf16.mxu1 %v208_v2  ;;  %v212_v5 = vld [vmem:[%s294_s1 + $0x24] ss:$16 sps:$4 sm:$0xff]   ;;  %v214_v6 = vld [vmem:[%s294_s1 + $0x2c] ss:$16 sps:$4 sm:$0xff]  }
   0x3   :  { %97 = vmatpush1.bf16.msra.mxu0 %v210_v3  ;;  %140 = vmatpush1.bf16.msra.mxu1 %v211_v4  ;;  %v216_v7 = vld [vmem:[%s294_s1 + $0x20] ss:$16 sps:$4 sm:$0xff]   ;;  %v217_v8 = vld [vmem:[%s294_s1 + $0x28] ss:$16 sps:$4 sm:$0xff]   ;;  %v28_v11 = vshrl.u32 %v27_v10, 7 }
   0x4   :  { %98 = vmatprep.subr.bf16.mxu0 %v212_v5  ;;  %141 = vmatprep.subr.bf16.mxu1 %v214_v6  ;;  %v218_v9 = vld [vmem:[%s295_s0] sm:$0xff]  }
   0x5   :  { %v29_v12 = vsub.s32 0, %v28_v11  ;;  %v37_v13 = vsub.s32 2, %v28_v11  ;;  %v25_v14 = vld [vmem:[%s296_s2] sm:$0xf]  ;;  %v33_v15 = vsub.s32 1, %v28_v11  ;;  %v41_v16 = vsub.s32 3, %v28_v11 }
   0x7   :  { %99 = vmatpush1.bf16.msra.mxu0 %v216_v7  ;;  %142 = vmatpush1.bf16.msra.mxu1 %v217_v8  ;;  %v30_v17 = vrot.slane %v25_v14, %v29_v12  ;;  %v38_v18 = vrot.slane %v25_v14, %v37_v13  ;;  %v34_v19 = vrot.slane %v25_v14, %v33_v15 }
   0x8   :  { %v42_v20 = vrot.slane %v25_v14, %v41_v16 }
   0xa   :  { %203 = vmatmul.mubr.msk.bf16.vlgmr.msra.gmra.mrb[0].mxu0 %vm92_vm0, %v218_v9  ;;  %204 = vmatmul.mubr.msk.bf16.vlgmr.msra.gmra.mrb[0].mxu1 %vm92_vm0, %v218_v9 }
  0xdd   :  { %v130_v21 = vpop.f32.mrb[0].mxu0  ;;  %v173_v22 = vpop.f32.mrb[0].mxu1 }
  0xde   :  { %v131_v23 = vadd.f32 %v130_v21, %v30_v17  ;;  %v174_v24 = vadd.f32 %v173_v22, %v38_v18  ;;  %v132_v25 = vpop.f32.mrb[1].mxu0  ;;  %v175_v26 = vpop.f32.mrb[1].mxu1 }
  0xdf   :  { %v133_v27 = vadd.f32 %v132_v25, %v34_v19  ;;  %v176_v28 = vadd.f32 %v175_v26, %v42_v20  ;;  %v134_v29 = vpop.f32.mrb[2].mxu0  ;;  %v177_v30 = vpop.f32.mrb[2].mxu1 }
  0xe0   :  { %182 = vst [vmem:[%s297_s3] sm:$0xff] %v131_v23  ;;  %184 = vst [vmem:[%s297_s3 + $0x10] sm:$0xff] %v174_v24  ;;  %v135_v31 = vadd.f32 %v134_v29, %v30_v17  ;;  %v178_v32 = vadd.f32 %v177_v30, %v38_v18  ;;  %v136_v33 = vpop.f32.mrb[3].mxu0  ;;  %v179_v34 = vpop.f32.mrb[3].mxu1 }
  0xe1   :  { %183 = vst [vmem:[%s297_s3 + $0x8] sm:$0xff] %v133_v27  ;;  %185 = vst [vmem:[%s297_s3 + $0x18] sm:$0xff] %v176_v28  ;;  %v137_v35 = vadd.f32 %v136_v33, %v34_v19  ;;  %v180_v36 = vadd.f32 %v179_v34, %v42_v20 }
  0xe2   :  { %186 = vst [vmem:[%s297_s3 + $0x20] sm:$0xff] %v135_v31  ;;  %188 = vst [vmem:[%s297_s3 + $0x30] sm:$0xff] %v178_v32 }
  0xe3   :  { %187 = vst [vmem:[%s297_s3 + $0x28] sm:$0xff] %v137_v35  ;;  %189 = vst [vmem:[%s297_s3 + $0x38] sm:$0xff] %v180_v36 }

// kernel: gpt_forward.9
= control target key start
LH: loop header
LB: loop body
LE: loop exit
PB: predicated region body
PF: predicated region fallthrough
CT: control target
= control target key end

     0   :  { %s1831_s12 = smov 0   ;;  %s1833_s13 = smov 0   ;;  %s2018_s0 = inlined_call_operand.vmem [shape: bf16[2,8,32], index: 0, kind: input, shape index: {}]   ;;  %s2019_s1 = inlined_call_operand.vmem [shape: bf16[2,8,32], index: 1, kind: input, shape index: {}]   ;;  %s2020_s2 = inlined_call_operand.vmem [shape: bf16[2,8,32], index: 2, kind: input, shape index: {}]   ;;  %s2021_s3 = inlined_call_operand.vmem [shape: bf16[2,8,32], index: 3, kind: output, shape index: {}]  }
   0x1   :  { %s1835_s14 = smov 0  }
   0x2 LB: > { %s32_s15 = sadd.s32 1, %s1795_s13  ;;  %p1616_p0 = scmp.ge.s32.totalorder %s1799_s14, 1  ;;  %s1799_s14 = sphi %s1835_s14, %s13_s14   ;;  %s1795_s13 = sphi %s1833_s13, %s2023_s13   ;;  %s1791_s12 = sphi %s1831_s12, %s2022_s12  }
   0x3   : > { %p34_p1 = scmp.ge.s32.totalorder %s32_s15, 2  ;;  %p206_p2 = scmp.lt.s32.totalorder %s1799_s14, 3 }
   0x5   : > { %s2025_s15 = smov (%p34_p1, %s32_s15), 0  ;;  %p207_p3 = pnand %p1616_p0, %p206_p2 }
   0x6   : > { %p252_p4 = scmp.lt.s32.totalorder (!%p207_p3), %s1791_s12, 1  ;;  %vm302_vm0 = vcmask (!%p207_p3), 64512   ;;  %v1801_v0 = vmov (!%p207_p3), 0.0   ;;  %vm1802_vm1 = vmmov (!%p207_p3), 0   ;;  %vm293_vm2 = vcmask (!%p207_p3), 7168   ;;  %s1805_s23 = smov (!%p207_p3), 120  }
   0x7   : > { %210 = sbr.rel (%p207_p3) target bundleno = 1470 (0x5be), region = 32  ;;  %1667 = vmatprep.subr.bf16.mxu0 (!%p207_p3), %v1801_v0  ;;  %303 = vst.msk [vmem:[#allocation4] sm:$0xff] (!%p207_p3), %vm302_vm0, %v1801_v0  ;;  %304 = vst.msk [vmem:[#allocation4 + $0x8] sm:$0xff] (!%p207_p3), %vm302_vm0, %v1801_v0  ;;  %1669 = vmatprep.mubr.msk.bf16.mxu0 (!%p207_p3), %vm1802_vm1, %v1801_v0  ;;  %v1803_v4 = vmov (!%p207_p3), -1e+30   ;;  %v869_v5 = vlaneseq (!%p207_p3)  ;;  %v1804_v15 = vmov (!%p207_p3), 0  }
   0x8   : > { %305 = vst.msk [vmem:[#allocation4 + $0x10] sm:$0xff] (!%p207_p3), %vm302_vm0, %v1801_v0  ;;  %306 = vst.msk [vmem:[#allocation4 + $0x18] sm:$0xff] (!%p207_p3), %vm302_vm0, %v1801_v0  ;;  %1673 = vmatprep.subr.bf16.mxu1 (!%p207_p3), %v1801_v0  ;;  %1675 = vmatprep.mubr.msk.bf16.mxu1 (!%p207_p3), %vm1802_vm1, %v1801_v0  ;;  %s1806_s24 = smov (!%p207_p3), 112   ;;  %s1807_s25 = smov (!%p207_p3), 104   ;;  %vm963_vm4 = vcmask (!%p207_p3), 1043456   ;;  %vm1443_vm5 = vcmask (!%p207_p3), 60416  }
   0x9   : > { %294 = vst.msk [vmem:[#allocation2] sm:$0xff] (!%p207_p3), %vm293_vm2, %v1803_v4  ;;  %295 = vst.msk [vmem:[#allocation2 + $0x8] sm:$0xff] (!%p207_p3), %vm293_vm2, %v1803_v4  ;;  %v1890_v6 = vshrl.u32 (!%p207_p3), %v869_v5, 7  ;;  %v1892_v7 = vand.u32 (!%p207_p3), 127, %v869_v5  ;;  %1749 = vset.pattern.permute.xlu0 (!%p207_p3), %v1804_v15  ;;  %1750 = vset.pattern.permute.xlu1 (!%p207_p3), %v1804_v15  ;;  %s1808_s5 = smov (!%p207_p3), 8   ;;  %s1809_s6 = smov (!%p207_p3), 16  }
   0xa   : > { %296 = vst.msk [vmem:[#allocation2 + $0x10] sm:$0xff] (!%p207_p3), %vm293_vm2, %v1803_v4  ;;  %297 = vst.msk [vmem:[#allocation2 + $0x18] sm:$0xff] (!%p207_p3), %vm293_vm2, %v1803_v4  ;;  %s1810_s7 = smov (!%p207_p3), 24   ;;  %vm1463_vm6 = vcmask (!%p207_p3), 126016   ;;  %vm1483_vm7 = vcmask (!%p207_p3), 191616   ;;  %vm1503_vm8 = vcmask (!%p207_p3), 257216  }
   0xb   : > { %298 = vst.msk [vmem:[#allocation3] sm:$0xff] (!%p207_p3), %vm293_vm2, %v1801_v0  ;;  %299 = vst.msk [vmem:[#allocation3 + $0x8] sm:$0xff] (!%p207_p3), %vm293_vm2, %v1801_v0  ;;  %vm878_vm3 = vcmp.le.s32.totalorder (!%p207_p3), %v1892_v7, %v1890_v6 }
   0xc   : > { %300 = vst.msk [vmem:[#allocation3 + $0x10] sm:$0xff] (!%p207_p3), %vm293_vm2, %v1801_v0  ;;  %301 = vst.msk [vmem:[#allocation3 + $0x18] sm:$0xff] (!%p207_p3), %vm293_vm2, %v1801_v0 }
   0xe   : > { %s2027_s12 = smov (!%p252_p4, %s1791_s12), 1 }
   0xf   : > { %s1863_s16 = sshll.u32 %s2027_s12, 2 }
  0x10   : > { %s267_s19 = scalar_lea.vmem %s2019_s1, %s1863_s16  ;;  %s258_s22 = scalar_lea.vmem %s2018_s0, %s1863_s16  ;;  %v1906_v18 = vld [vmem:[#allocation2] sm:$0xff]  ;;  %v1958_v63 = vld [vmem:[#allocation2 + $0x8] sm:$0xff] }
  0x11   : > { %v866_v1 = vld [vmem:[%s267_s19] sm:$0xf]  ;;  %s278_s28 = scalar_lea.vmem %s2020_s2, %s1863_s16  ;;  %v1209_v4 = vld [vmem:[#allocation2 + $0x10] sm:$0xff]  ;;  %v1346_v6 = vld [vmem:[#allocation2 + $0x18] sm:$0xff]  ;;  %s2000_s4 = scalar_lea.vmem %s2021_s3, %s1863_s16 }
  0x12   : > { %v884_v2 = vsel %vm302_vm0, %v866_v1, 0  ;;  %v865_v3 = vld [vmem:[%s258_s22] sm:$0xf]  ;;  %v1635_v16 = vcombine.low %v866_v1, %v866_v1 }
  0x13   : > { %1668 = vmatpush3.bf16.xpose.msra.mxu0 %v884_v2  ;;  %v1634_v17 = vcombine.low %v865_v3, %v865_v3  ;;  %v1920_v22 = vld [vmem:[%s278_s28] sm:$0xf] }
  0x14   : > { %1685 = vmatprep.subr.bf16.mxu0 %v1801_v0  ;;  %1018 = vrot.lane.b32.xlu1 %v1635_v16, %s1805_s23  ;;  %v965_v23 = vsel %vm963_vm4, %v1920_v22, 0 }
  0x15   : > { %1674 = vmatpush3.bf16.msra.mxu1 %v965_v23 }
  0x16   : > { %1679 = vmatprep.subr.bf16.mxu1 %v1801_v0 }
  0x18   : > { %1013 = vrot.lane.b32.xlu1 %v1634_v17, %s1805_s23 }
  0x1a   : > { %1670 = vmatmul.mubr.msk.bf16.vlgmr.msra.gmra.mrb[0].mxu0 %vm302_vm0, %v865_v3 }
  0x1b   : > { %1687 = vmatprep.mubr.msk.bf16.mxu0 %vm1802_vm1, %v1801_v0 }
  0x1c   : > { %1158 = vrot.lane.b32.xlu1 %v1635_v16, %s1806_s24 }
  0x20   : > { %1156 = vrot.lane.b32.xlu1 %v1634_v17, %s1806_s24 }
  0x24   : > { %1295 = vrot.lane.b32.xlu1 %v1635_v16, %s1807_s25 }
  0x28   : > { %1293 = vrot.lane.b32.xlu1 %v1634_v17, %s1807_s25 }
  0x86   : > { %v1019_v27 = vpop.permute.xlu1 %1018 }
  0x87   : > { %v1024_v30 = vsel %vm302_vm0, %v1019_v27, 0 }
  0x8a   : > { %v1014_v28 = vpop.permute.xlu1 %1013 }
  0x8e   : > { %v1159_v32 = vpop.permute.xlu1 %1158 }
  0x8f   : > { %v1164_v34 = vsel %vm302_vm0, %v1159_v32, 0 }
  0x92   : > { %v1157_v33 = vpop.permute.xlu1 %1156 }
  0x96   : > { %v1296_v35 = vpop.permute.xlu1 %1295 }
  0x97   : > { %v1301_v36 = vsel %vm302_vm0, %v1296_v35, 0 }
  0x9a   : > { %v1294_v37 = vpop.permute.xlu1 %1293 }
  0xed   : > { %v920_v8 = vpop.f32.mrb[0].mxu0 }
  0xee   : > { %v926_v9 = vmul.f32 0.35355338, %v920_v8  ;;  %v1671_v10 = vpop.f32.mrb[1].mxu0 }
  0xef   : > { %v923_v11 = vpop.f32.mrb[2].mxu0 }
  0xf0   : > { %v1672_v12 = vpop.f32.mrb[3].mxu0  ;;  %v927_v13 = vsel %vm878_vm3, %v926_v9, -1e+30  ;;  %v1637_v11 = vcombine.low %v1920_v22, %v1920_v22 }
  0xf1   : > { %v929_v14 = vsel %vm302_vm0, %v927_v13, -inf }
  0xf2   : > { %930 = vmax.xlane.f32.xlu0 %v929_v14 }
 0x17f   : > { %v931_v19 = vpop.xlane.xlu0 %930 }
 0x180   : > { %v1909_v20 = vmax.f32 %v1906_v18, %v931_v19 }
 0x182   : > { %v933_v21 = vsub.f32 %v1906_v18, %v1909_v20  ;;  %1009 = vst.msk [vmem:[#allocation2] sm:$0xff] %vm293_vm2, %v1909_v20  ;;  %938 = vperm.xlu0 %1749, %v1909_v20  }
 0x201   : > { %v939_v24 = vpop.permute.xlu0 %938 }
 0x202   : > { %v941_v25 = vsub.f32 %v927_v13, %v939_v24 }
 0x204   : > { %v942_v26 = vmul.f32 1.442695, %v941_v25 }
 0x206   : > { %1753 = vpow2.f32 %v942_v26 }
 0x210   : > { %v1925_v29 = vpop.eup %1753 }
 0x211   : > { %v959_v31 = vpack.c.bf16 %v1925_v29, %v1925_v29  ;;  %v946_v13 = vsel %vm302_vm0, %v1925_v29, 0.0 }
 0x213   : > { %1676 = vmatmul.mubr.msk.bf16.vlgmr.msra.gmra.mrb[0].mxu1 %vm302_vm0, %v959_v31 }
 0x214   : > { %1680 = vmatpush3.bf16.xpose.msra.mxu1 %v1024_v30  ;;  %1681 = vmatprep.mubr.msk.bf16.mxu1 %vm1802_vm1, %v1801_v0 }
 0x215   : > { %1691 = vmatprep.subr.bf16.mxu1 %v1801_v0 }
 0x21b   : > { %1682 = vmatmul.mubr.msk.bf16.vlgmr.msra.gmra.mrb[4].mxu1 %vm302_vm0, %v1014_v28 }
 0x21c   : > { %1692 = vmatpush3.bf16.xpose.msra.mxu1 %v1164_v34  ;;  %1693 = vmatprep.mubr.msk.bf16.mxu1 %vm1802_vm1, %v1801_v0 }
 0x21d   : > { %1703 = vmatprep.subr.bf16.mxu1 %v1801_v0 }
 0x223   : > { %1694 = vmatmul.mubr.msk.bf16.vlgmr.msra.gmra.mrb[8].mxu1 %vm302_vm0, %v1157_v33 }
 0x224   : > { %1704 = vmatpush3.bf16.xpose.msra.mxu1 %v1301_v36  ;;  %1705 = vmatprep.mubr.msk.bf16.mxu1 %vm1802_vm1, %v1801_v0 }
 0x22b   : > { %1706 = vmatmul.mubr.msk.bf16.vlgmr.msra.gmra.mrb[12].mxu1 %vm302_vm0, %v1294_v37 }
 0x2e6   : > { %v1944_v38 = vpop.f32.mrb[0].mxu1 }
 0x2e7   : > { %v1677_v39 = vpop.f32.mrb[1].mxu1 }
 0x2e8   : > { %v1004_v40 = vpop.f32.mrb[2].mxu1 }
 0x2e9   : > { %v1678_v41 = vpop.f32.mrb[3].mxu1  ;;  %v934_v40 = vmul.f32 1.442695, %v933_v21 }
 0x2ee   : > { %v1060_v42 = vpop.f32.mrb[4].mxu1 }
 0x2ef   : > { %v1066_v43 = vmul.f32 0.35355338, %v1060_v42  ;;  %v1683_v44 = vpop.f32.mrb[5].mxu1 }
 0x2f0   : > { %v1063_v45 = vpop.f32.mrb[6].mxu1 }
 0x2f1   : > { %v1684_v46 = vpop.f32.mrb[7].mxu1  ;;  %v1067_v47 = vsel %vm878_vm3, %v1066_v43, -1e+30 }
 0x2f2   : > { %v1070_v48 = vsel %vm302_vm0, %v1067_v47, -inf }
 0x2f3   : > { %1071 = vmax.xlane.f32.xlu1 %v1070_v48 }
 0x2f6   : > { %v1200_v49 = vpop.f32.mrb[8].mxu1 }
 0x2f7   : > { %v1206_v50 = vmul.f32 0.35355338, %v1200_v49  ;;  %v1695_v51 = vpop.f32.mrb[9].mxu1 }
 0x2f8   : > { %v1203_v52 = vpop.f32.mrb[10].mxu1  ;;  %v1086_v51 = vld [vmem:[#allocation3 + $0x8] sm:$0xff] }
 0x2f9   : > { %v1696_v53 = vpop.f32.mrb[11].mxu1  ;;  %v1207_v54 = vsel %vm878_vm3, %v1206_v50, -1e+30 }
 0x2fa   : > { %v1210_v55 = vsel %vm302_vm0, %v1207_v54, -inf }
 0x2fb   : > { %1211 = vmax.xlane.f32.xlu0 %v1210_v55  ;;  %v1226_v55 = vld [vmem:[#allocation3 + $0x10] sm:$0xff] }
 0x2fe   : > { %v1337_v56 = vpop.f32.mrb[12].mxu1 }
 0x2ff   : > { %v1343_v57 = vmul.f32 0.35355338, %v1337_v56  ;;  %v1707_v58 = vpop.f32.mrb[13].mxu1 }
 0x300   : > { %v1340_v59 = vpop.f32.mrb[14].mxu1 }
 0x301   : > { %v1708_v60 = vpop.f32.mrb[15].mxu1  ;;  %v1344_v61 = vsel %vm878_vm3, %v1343_v57, -1e+30 }
 0x302   : > { %v1347_v62 = vsel %vm302_vm0, %v1344_v61, -inf  ;;  %v1363_v60 = vld [vmem:[#allocation3 + $0x18] sm:$0xff] }
 0x303   : > { %1348 = vmax.xlane.f32.xlu1 %v1347_v62 }
 0x380   : > { %v1072_v1 = vpop.xlane.xlu1 %1071 }
 0x381   : > { %v1073_v2 = vmax.f32 %v1958_v63, %v1072_v1 }
 0x383   : > { %v1074_v3 = vsub.f32 %v1958_v63, %v1073_v2  ;;  %1155 = vst.msk [vmem:[#allocation2 + $0x8] sm:$0xff] %vm293_vm2, %v1073_v2  ;;  %1079 = vperm.xlu1 %1750, %v1073_v2  }
 0x385   : > { %v1075_v42 = vmul.f32 1.442695, %v1074_v3 }
 0x388   : > { %v1212_v5 = vpop.xlane.xlu0 %1211 }
 0x389   : > { %v1213_v8 = vmax.f32 %v1209_v4, %v1212_v5 }
 0x38b   : > { %v1214_v9 = vsub.f32 %v1209_v4, %v1213_v8  ;;  %1292 = vst.msk [vmem:[#allocation2 + $0x10] sm:$0xff] %vm293_vm2, %v1213_v8  ;;  %1219 = vperm.xlu0 %1749, %v1213_v8  }
 0x38d   : > { %v1215_v44 = vmul.f32 1.442695, %v1214_v9 }
 0x390   : > { %v1349_v7 = vpop.xlane.xlu1 %1348 }
 0x391   : > { %v1350_v10 = vmax.f32 %v1346_v6, %v1349_v7 }
 0x393   : > { %v1351_v12 = vsub.f32 %v1346_v6, %v1350_v10  ;;  %1429 = vst.msk [vmem:[#allocation2 + $0x18] sm:$0xff] %vm293_vm2, %v1350_v10  ;;  %1356 = vperm.xlu1 %1750, %v1350_v10  }
 0x395   : > { %v1352_v43 = vmul.f32 1.442695, %v1351_v12 }
 0x397   : > { %1105 = vrot.lane.b32.xlu1 %v1637_v11, %s1805_s23 }
 0x39b   : > { %1242 = vrot.lane.b32.xlu1 %v1637_v11, %s1806_s24 }
 0x39f   : > { %1379 = vrot.lane.b32.xlu1 %v1637_v11, %s1807_s25 }
 0x3c3   : > { %947 = vadd.xlane.f32.xlu1 %v946_v13  ;;  %v1094_v13 = vld [vmem:[#allocation4 + $0x8] sm:$0xff] }
 0x402   : > { %v1080_v14 = vpop.permute.xlu1 %1079 }
 0x403   : > { %v1082_v15 = vsub.f32 %v1067_v47, %v1080_v14  ;;  %v944_v47 = vld [vmem:[#allocation3] sm:$0xff] }
 0x405   : > { %v1083_v16 = vmul.f32 1.442695, %v1082_v15 }
 0x407   : > { %1755 = vpow2.f32 %v1083_v16 }
 0x40a   : > { %v1220_v17 = vpop.permute.xlu0 %1219 }
 0x40b   : > { %v1222_v19 = vsub.f32 %v1207_v54, %v1220_v17 }
 0x40d   : > { %v1223_v22 = vmul.f32 1.442695, %v1222_v19 }
 0x40f   : > { %1757 = vpow2.f32 %v1223_v22 }
 0x411   : > { %v1756_v23 = vpop.eup %1755 }
 0x412   : > { %v1357_v24 = vpop.permute.xlu1 %1356  ;;  %v1088_v25 = vsel %vm302_vm0, %v1756_v23, 0.0  ;;  %v1101_v31 = vpack.c.bf16 %v1756_v23, %v1756_v23  ;;  %v1234_v23 = vld [vmem:[#allocation4 + $0x10] sm:$0xff] }
 0x413   : > { %v1359_v26 = vsub.f32 %v1344_v61, %v1357_v24  ;;  %1089 = vadd.xlane.f32.xlu0 %v1088_v25  ;;  %v952_v61 = vld [vmem:[#allocation4] sm:$0xff] }
 0x415   : > { %v1360_v27 = vmul.f32 1.442695, %v1359_v26 }
 0x416   : > { %v1106_v28 = vpop.permute.xlu1 %1105 }
 0x417   : > { %1759 = vpow2.f32 %v1360_v27  ;;  %v1111_v29 = vsel %vm963_vm4, %v1106_v28, 0 }
 0x418   : > { %1686 = vmatpush3.bf16.msra.mxu0 %v1111_v29  ;;  %1761 = vpow2.f32 %v934_v40 }
 0x419   : > { %v1758_v30 = vpop.eup %1757  ;;  %1697 = vmatprep.subr.bf16.mxu0 %v1801_v0  ;;  %1763 = vpow2.f32 %v1075_v42 }
 0x41a   : > { %v1228_v32 = vsel %vm302_vm0, %v1758_v30, 0.0  ;;  %v1243_v33 = vpop.permute.xlu1 %1242  ;;  %v1241_v37 = vpack.c.bf16 %v1758_v30, %v1758_v30  ;;  %1765 = vpow2.f32 %v1352_v43  ;;  %v1371_v30 = vld [vmem:[#allocation4 + $0x18] sm:$0xff] }
 0x41b   : > { %1229 = vadd.xlane.f32.xlu0 %v1228_v32  ;;  %1688 = vmatmul.mubr.msk.bf16.vlgmr.msra.gmra.mrb[4].mxu0 %vm302_vm0, %v1101_v31  ;;  %v1248_v34 = vsel %vm963_vm4, %v1243_v33, 0  ;;  %1767 = vpow2.f32 %v1215_v44 }
 0x41c   : > { %1698 = vmatpush3.bf16.msra.mxu0 %v1248_v34  ;;  %1699 = vmatprep.mubr.msk.bf16.mxu0 %vm1802_vm1, %v1801_v0 }
 0x41d   : > { %1709 = vmatprep.subr.bf16.mxu0 %v1801_v0 }
 0x41e   : > { %v1380_v35 = vpop.permute.xlu1 %1379 }
 0x41f   : > { %v1385_v39 = vsel %vm963_vm4, %v1380_v35, 0 }
 0x421   : > { %v1760_v36 = vpop.eup %1759 }
 0x422   : > { %v1365_v41 = vsel %vm302_vm0, %v1760_v36, 0.0  ;;  %v1378_v45 = vpack.c.bf16 %v1760_v36, %v1760_v36  ;;  %v1762_v18 = vpop.eup %1761 }
 0x423   : > { %1700 = vmatmul.mubr.msk.bf16.vlgmr.msra.gmra.mrb[8].mxu0 %vm302_vm0, %v1241_v37  ;;  %1366 = vadd.xlane.f32.xlu1 %v1365_v41  ;;  %v1764_v20 = vpop.eup %1763 }
 0x424   : > { %1710 = vmatpush3.bf16.msra.mxu0 %v1385_v39  ;;  %1711 = vmatprep.mubr.msk.bf16.mxu0 %vm1802_vm1, %v1801_v0  ;;  %v1766_v21 = vpop.eup %1765  ;;  %v945_v0 = vmul.f32 %v1762_v18, %v944_v47  ;;  %v1087_v52 = vmul.f32 %v1764_v20, %v1086_v51 }
 0x425   : > { %v1768_v46 = vpop.eup %1767  ;;  %v1364_v62 = vmul.f32 %v1766_v21, %v1363_v60 }
 0x426   : > { %v1227_v56 = vmul.f32 %v1768_v46, %v1226_v55 }
 0x42b   : > { %1712 = vmatmul.mubr.msk.bf16.vlgmr.msra.gmra.mrb[12].mxu0 %vm302_vm0, %v1378_v45 }
 0x431   : > { %955 = vperm.xlu0 %1749, %v1762_v18  }
 0x434   : > { %1097 = vperm.xlu1 %1750, %v1764_v20  }
 0x435   : > { %1374 = vperm.xlu0 %1749, %v1766_v21  }
 0x438   : > { %1237 = vperm.xlu1 %1750, %v1768_v46  }
 0x450   : > { %v948_v48 = vpop.xlane.xlu1 %947 }
 0x451   : > { %v949_v49 = vadd.f32 %v948_v48, %v945_v0 }
 0x453   : > { %951 = vst.msk [vmem:[#allocation3] sm:$0xff] %vm293_vm2, %v949_v49 }
 0x45a   : > { %v1434_v50 = vld [vmem:[#allocation3] sm:$0xff] }
 0x45b   : > { %1437 = vperm.xlu1 %1750, %v1434_v50  }
 0x4a0   : > { %v1090_v53 = vpop.xlane.xlu0 %1089 }
 0x4a1   : > { %v1091_v54 = vadd.f32 %v1090_v53, %v1087_v52 }
 0x4a3   : > { %1092 = vst.msk [vmem:[#allocation3 + $0x8] sm:$0xff] %vm293_vm2, %v1091_v54 }
 0x4a8   : > { %v1230_v57 = vpop.xlane.xlu0 %1229 }
 0x4a9   : > { %v1231_v58 = vadd.f32 %v1230_v57, %v1227_v56 }
 0x4aa   : > { %v1448_v59 = vld [vmem:[#allocation3 + $0x8] sm:$0xff] }
 0x4ab   : > { %1232 = vst.msk [vmem:[#allocation3 + $0x10] sm:$0xff] %vm293_vm2, %v1231_v58  ;;  %1451 = vperm.xlu0 %1749, %v1448_v59  }
 0x4b0   : > { %v1367_v63 = vpop.xlane.xlu1 %1366  ;;  %v956_v1 = vpop.permute.xlu0 %955 }
 0x4b1   : > { %v1368_v2 = vadd.f32 %v1367_v63, %v1364_v62  ;;  %v958_v3 = vmul.f32 %v956_v1, %v952_v61 }
 0x4b2   : > { %v1468_v4 = vld [vmem:[#allocation3 + $0x10] sm:$0xff] }
 0x4b3   : > { %1369 = vst.msk [vmem:[#allocation3 + $0x18] sm:$0xff] %vm293_vm2, %v1368_v2  ;;  %v1007_v5 = vadd.f32 %v1944_v38, %v958_v3  ;;  %1471 = vperm.xlu0 %1749, %v1468_v4  }
 0x4b4   : > { %v1098_v9 = vpop.permute.xlu1 %1097  ;;  %v1375_v31 = vpop.permute.xlu0 %1374 }
 0x4b5   : > { %1008 = vst.msk [vmem:[#allocation4] sm:$0xff] %vm302_vm0, %v1007_v5  ;;  %v1100_v14 = vmul.f32 %v1098_v9, %v1094_v13  ;;  %v1377_v32 = vmul.f32 %v1375_v31, %v1371_v30 }
 0x4b8   : > { %v1238_v6 = vpop.permute.xlu1 %1237 }
 0x4b9   : > { %v1240_v24 = vmul.f32 %v1238_v6, %v1234_v23 }
 0x4ba   : > { %v1488_v8 = vld [vmem:[#allocation3 + $0x18] sm:$0xff] }
 0x4bb   : > { %1491 = vperm.xlu0 %1749, %v1488_v8  }
 0x4bc   : > { %v1433_v11 = vld [vmem:[#allocation4] sm:$0xff] }
 0x4da   : > { %v1438_v7 = vpop.permute.xlu1 %1437 }
 0x4db   : > { %1769 = vrcp.f32 %v1438_v7 }
 0x4e5   : > { %v1770_v10 = vpop.eup %1769 }
 0x4e6   : > { %v1441_v12 = vmul.f32 %v1770_v10, %v1433_v11 }
 0x4e8   : > { %v1442_v38 = vpack.c.bf16 %v1441_v12, %v1441_v12 }
 0x4ea   : > { %1444 = vst.msk [vmem:[%s2000_s4] sm:$0xf] %vm1443_vm5, %v1442_v38 }
 0x4ee   : > { %v1147_v15 = vpop.f32.mrb[4].mxu0 }
 0x4ef   : > { %v1153_v16 = vadd.f32 %v1147_v15, %v1100_v14  ;;  %v1689_v17 = vpop.f32.mrb[5].mxu0 }
 0x4f0   : > { %v1150_v19 = vpop.f32.mrb[6].mxu0 }
 0x4f1   : > { %1154 = vst.msk [vmem:[#allocation4 + $0x8] sm:$0xff] %vm302_vm0, %v1153_v16  ;;  %v1690_v22 = vpop.f32.mrb[7].mxu0 }
 0x4f6   : > { %v1284_v25 = vpop.f32.mrb[8].mxu0 }
 0x4f7   : > { %v1290_v26 = vadd.f32 %v1284_v25, %v1240_v24  ;;  %v1701_v27 = vpop.f32.mrb[9].mxu0 }
 0x4f8   : > { %v1287_v28 = vpop.f32.mrb[10].mxu0  ;;  %v1446_v42 = vld [vmem:[#allocation4 + $0x8] sm:$0xff] }
 0x4f9   : > { %1291 = vst.msk [vmem:[#allocation4 + $0x10] sm:$0xff] %vm302_vm0, %v1290_v26  ;;  %v1702_v29 = vpop.f32.mrb[11].mxu0 }
 0x4fe   : > { %v1421_v33 = vpop.f32.mrb[12].mxu0 }
 0x4ff   : > { %v1427_v34 = vadd.f32 %v1421_v33, %v1377_v32  ;;  %v1713_v35 = vpop.f32.mrb[13].mxu0 }
 0x500   : > { %v1424_v36 = vpop.f32.mrb[14].mxu0  ;;  %v1466_v20 = vld [vmem:[#allocation4 + $0x10] sm:$0xff] }
 0x501   : > { %1428 = vst.msk [vmem:[#allocation4 + $0x18] sm:$0xff] %vm302_vm0, %v1427_v34  ;;  %v1714_v37 = vpop.f32.mrb[15].mxu0 }
 0x508   : > { %v1486_v0 = vld [vmem:[#allocation4 + $0x18] sm:$0xff] }
 0x52a   : > { %v1452_v39 = vpop.permute.xlu0 %1451 }
 0x52b   : > { %1771 = vrcp.f32 %v1452_v39 }
 0x532   : > { %v1472_v40 = vpop.permute.xlu0 %1471 }
 0x533   : > { %1773 = vrcp.f32 %v1472_v40 }
 0x535   : > { %v1772_v41 = vpop.eup %1771 }
 0x536   : > { %v1455_v43 = vmul.f32 %v1772_v41, %v1446_v42 }
 0x538   : > { %v1648_v44 = vpack.c.bf16 %v1455_v43, %v1455_v43 }
 0x53a   : > { %v1492_v45 = vpop.permute.xlu0 %1491  ;;  %1460 = vrot.lane.b32.xlu1 %v1648_v44, %s1808_s5 }
 0x53b   : > { %1775 = vrcp.f32 %v1492_v45 }
 0x53d   : > { %v1774_v18 = vpop.eup %1773 }
 0x53e   : > { %v1475_v21 = vmul.f32 %v1774_v18, %v1466_v20 }
 0x540   : > { %v1649_v46 = vpack.c.bf16 %v1475_v21, %v1475_v21 }
 0x542   : > { %1480 = vrot.lane.b32.xlu1 %v1649_v46, %s1809_s6 }
 0x545   : > { %v1776_v47 = vpop.eup %1775 }
 0x546   : > { %v1495_v48 = vmul.f32 %v1776_v47, %v1486_v0 }
 0x548   : > { %v1650_v49 = vpack.c.bf16 %v1495_v48, %v1495_v48 }
 0x54a   : > { %1500 = vrot.lane.b32.xlu1 %v1650_v49, %s1810_s7 }
 0x5ac   : > { %v1461_v50 = vpop.permute.xlu1 %1460 }
 0x5ad   : > { %1464 = vst.msk [vmem:[%s2000_s4] sm:$0xf] %vm1463_vm6, %v1461_v50 }
 0x5b4   : > { %v1481_v51 = vpop.permute.xlu1 %1480 }
 0x5b5   : > { %1484 = vst.msk [vmem:[%s2000_s4] sm:$0xf] %vm1483_vm7, %v1481_v51 }
 0x5bc   : > { %v1501_v52 = vpop.permute.xlu1 %1500 }
 0x5bd   : > { %1504 = vst.msk [vmem:[%s2000_s4] sm:$0xf] %vm1503_vm8, %v1501_v52 }
 0x5be PF: > { %s13_s14 = sadd.s32 1, %s1799_s14   ;;  %s2022_s12 = smov %s1795_s13 }
 0x5bf   : > { %p10_p5 = scmp.ge.s32.totalorder %s13_s14, 4   ;;  %s2023_s13 = smov %s2025_s15 }
 0x5c1   :  { %12 = sbr.rel (!%p10_p5) target bundleno = 2 (0x2), region = 108 }

</bundles_post_ra>
